<compile_context>
chip_gen: v5e
topology: v5e:2x2
jax: 0.10.0
libtpu: 0.0.40
codegen_flags: <defaults>
</compile_context>

<pallas_src>
import jax
import jax.numpy as jnp
from jax import lax
from jax.experimental import pallas as pl
from jax.experimental.pallas import tpu as pltpu

KERNEL_SIZE = 3
DILATIONS = (1, 3, 5)
LRELU_SLOPE = 0.1
HALO = 128   # per-side halo loaded from neighbour tiles (>= 18-col receptive field, lane aligned)
PAD = 128    # zero border inside the conv scratch (>= max dilation 5), keeps center writes aligned


def _make_kernel(C, T, t_tile):
    W = t_tile + 2 * HALO  # working window width (lanes)

    def kernel(xl_ref, xm_ref, xr_ref, w1_ref, b1_ref, w2_ref, b2_ref, o_ref, xp_ref):
        # Zero only the two border strips of the scratch, once.  Border values can
        # never influence the T_TILE columns that are written out (HALO=128 >> 18-col
        # receptive field), so this is belt-and-braces rather than a hard requirement
        # (safe even when the parallel grid axes are sharded across TensorCores).
        @pl.when(jnp.logical_and(pl.program_id(0) == 0, pl.program_id(1) == 0))
        def _():
            xp_ref[:, :PAD] = jnp.zeros((C, PAD), xp_ref.dtype)
            xp_ref[:, PAD + W:] = jnp.zeros((C, PAD), xp_ref.dtype)

        # Assemble the working window [left halo | tile | right halo] -> (C, W), f32.
        xw = jnp.concatenate([xl_ref[0], xm_ref[0], xr_ref[0]], axis=-1).astype(jnp.float32)

        # Global column index of every window column.  Masking conv inputs outside
        # [0, T) reproduces each conv's zero padding at the true sequence boundaries
        # and neutralises the clamped halo blocks at the first / last tile.
        g0 = pl.program_id(1) * t_tile - HALO
        cols = lax.broadcasted_iota(jnp.int32, (1, W), 1) + g0
        valid = jnp.logical_and(cols >= 0, cols < T)            # (1, W)

        def dilated_conv(prev, w_ref, b_ref, i, d):
            # leaky_relu + boundary mask, cast to bf16 for the MXU.
            ci = jnp.where(valid, jnp.where(prev >= 0, prev, LRELU_SLOPE * prev), 0.0)
            xp_ref[:, PAD:PAD + W] = ci.astype(xp_ref.dtype)
            acc = None
            for k in range(KERNEL_SIZE):
                off = PAD + (k - 1) * d                          # static lane offset
                seg = xp_ref[:, off:off + W]                     # (C_in, W) bf16
                part = jnp.dot(w_ref[i, k], seg,                 # (C_out,C_in)@(C_in,W) on MXU
                               preferred_element_type=jnp.float32)
                acc = part if acc is None else acc + part
            return acc + b_ref[i]                                # (C,1) broadcast over (C,W)

        for i, d in enumerate(DILATIONS):
            h = dilated_conv(xw, w1_ref, b1_ref, i, d)
            h = dilated_conv(h, w2_ref, b2_ref, i, d)
            xw = h + xw                                          # residual add, f32

        o_ref[0] = xw[:, HALO:HALO + t_tile].astype(o_ref.dtype)  # lane-dense (C, T_TILE) store

    return kernel


def resblock1_forward(x, w1, b1, w2, b2, *, t_tile=None):
    """x: (B, C, T) f32.  w1/w2: (n, C_out, C_in, K) f32.  b1/b2: (n, C) f32."""
    B, C, T = x.shape
    if t_tile is None:
        # lane-aligned tile, capped so double-buffered tiles + single-copy weights fit
        # comfortably in VMEM on v5e/v6e (128 MiB) and v7x (64 MiB) at C=512.
        t_tile = min(1024, pl.cdiv(T, 128) * 128)
    assert t_tile % 128 == 0
    T_pad = pl.cdiv(T, t_tile) * t_tile
    nT = T_pad // t_tile
    m = t_tile // 128          # tile width in 128-col blocks
    n128 = T_pad // 128        # total number of 128-col blocks

    x_p = jnp.pad(x, ((0, 0), (0, 0), (0, T_pad - T)))

    # MXU-friendly weight layout (n, K, C_out, C_in) in bf16; biases (n, C, 1) f32.
    w1_t = jnp.transpose(w1, (0, 3, 1, 2)).astype(jnp.bfloat16)
    w2_t = jnp.transpose(w2, (0, 3, 1, 2)).astype(jnp.bfloat16)
    b1_t = b1.astype(jnp.float32)[:, :, None]
    b2_t = b2.astype(jnp.float32)[:, :, None]

    # Whole-array VMEM operands: one resident copy, no per-step double-buffered DMA.
    vmem_spec = pl.BlockSpec(memory_space=pltpu.MemorySpace.VMEM)

    out = pl.pallas_call(
        _make_kernel(C, T, t_tile),
        out_shape=jax.ShapeDtypeStruct((B, C, T_pad), x.dtype),
        grid_spec=pltpu.PrefetchScalarGridSpec(
            num_scalar_prefetch=0,
            grid=(B, nT),
            in_specs=[
                # left halo: previous 128-col block (clamped; mask handles the edge)
                pl.BlockSpec((1, C, 128), lambda b, t: (b, 0, jnp.maximum(t * m - 1, 0))),
                # main tile
                pl.BlockSpec((1, C, t_tile), lambda b, t: (b, 0, t)),
                # right halo: next 128-col block (clamped; mask handles the edge)
                pl.BlockSpec((1, C, 128), lambda b, t: (b, 0, jnp.minimum((t + 1) * m, n128 - 1))),
                vmem_spec, vmem_spec, vmem_spec, vmem_spec,      # w1, b1, w2, b2
            ],
            out_specs=pl.BlockSpec((1, C, t_tile), lambda b, t: (b, 0, t)),
            scratch_shapes=[pltpu.VMEM((C, t_tile + 2 * HALO + 2 * PAD), jnp.bfloat16)],
        ),
        compiler_params=pltpu.CompilerParams(
            dimension_semantics=("parallel", "parallel"),
            vmem_limit_bytes=64 * 1024 * 1024,
        ),
    )(x_p, x_p, x_p, w1_t, b1_t, w2_t, b2_t)
    return out[:, :, :T]


# ---------------- parameter init (weight_norm reparameterization) ----------------

def init_weightnorm_conv(key, C, K):
    """Deterministic init mimicking nn.utils.weight_norm(nn.Conv1d(C, C, K))."""
    kv, kg, kb = jax.random.split(key, 3)
    bound = 1.0 / jnp.sqrt(C * K)
    v = jax.random.uniform(kv, (C, C, K), jnp.float32, -bound, bound)
    g = jax.random.uniform(kg, (C, 1, 1), jnp.float32, 0.5, 1.5)
    norm = jnp.sqrt(jnp.sum(v * v, axis=(1, 2), keepdims=True))
    w = g * v / norm                                  # effective weight
    b = jax.random.uniform(kb, (C,), jnp.float32, -bound, bound)
    return w, b


def build_params(key, C):
    keys = jax.random.split(key, 2 * len(DILATIONS))
    w1s, b1s, w2s, b2s = [], [], [], []
    for i in range(len(DILATIONS)):
        w, b = init_weightnorm_conv(keys[i], C, KERNEL_SIZE)
        w1s.append(w); b1s.append(b)
        w, b = init_weightnorm_conv(keys[len(DILATIONS) + i], C, KERNEL_SIZE)
        w2s.append(w); b2s.append(b)
    return jnp.stack(w1s), jnp.stack(b1s), jnp.stack(w2s), jnp.stack(b2s)


# ---------------- pure-JAX (f32) reference for verification ----------------

def _conv1d_ref(x, w, b, dilation):
    pad = dilation * (KERNEL_SIZE // 2)
    out = lax.conv_general_dilated(
        x, w, window_strides=(1,), padding=[(pad, pad)],
        rhs_dilation=(dilation,),
        dimension_numbers=("NCH", "OIH", "NCH"))
    return out + b[None, :, None]


def resblock1_ref(x, w1, b1, w2, b2):
    for i, d in enumerate(DILATIONS):
        xt = jnp.where(x >= 0, x, LRELU_SLOPE * x)
        xt = _conv1d_ref(xt, w1[i], b1[i], d)
        xt = jnp.where(xt >= 0, xt, LRELU_SLOPE * xt)
        xt = _conv1d_ref(xt, w2[i], b2[i], d)
        x = xt + x
    return x


if __name__ == "__main__":
    key = jax.random.PRNGKey(0)
    k1, k2, k3, k4 = jax.random.split(key, 4)

    # Test 1: single T tile (toy HiFi-GAN sizes).
    B, C, T = 2, 4, 16
    w1, b1, w2, b2 = build_params(k1, C)
    x = jax.random.normal(k2, (B, C, T), jnp.float32)
    out = jax.block_until_ready(resblock1_forward(x, w1, b1, w2, b2))
    ref = resblock1_ref(x, w1, b1, w2, b2)
    assert out.shape == (B, C, T)
    # bf16 MXU matmuls vs f32 reference -> modest tolerance.
    assert jnp.allclose(out, ref, atol=5e-2, rtol=5e-2), "mismatch vs JAX reference (single tile)"

    # Test 2: multiple T tiles with halo exchange and ragged T.
    B, C, T = 1, 8, 200
    w1, b1, w2, b2 = build_params(k3, C)
    x = jax.random.normal(k4, (B, C, T), jnp.float32)
    out = jax.block_until_ready(resblock1_forward(x, w1, b1, w2, b2, t_tile=128))
    ref = resblock1_ref(x, w1, b1, w2, b2)
    assert out.shape == (B, C, T)
    assert jnp.allclose(out, ref, atol=5e-2, rtol=5e-2), "mismatch vs JAX reference (tiled T)"

    print("KERNEL_OK")
</pallas_src>

<mosaic_0001>
module attributes {stable_mosaic.version = 11 : i64} {
  func.func @kernel(%arg0: i32, %arg1: i32, %arg2: memref<1x4x128xf32, #tpu.memory_space<vmem>>, %arg3: memref<1x4x128xf32, #tpu.memory_space<vmem>>, %arg4: memref<1x4x128xf32, #tpu.memory_space<vmem>>, %arg5: memref<3x3x4x4xbf16, #tpu.memory_space<vmem>>, %arg6: memref<3x4x1xf32, #tpu.memory_space<vmem>>, %arg7: memref<3x3x4x4xbf16, #tpu.memory_space<vmem>>, %arg8: memref<3x4x1xf32, #tpu.memory_space<vmem>>, %arg9: memref<1x4x128xf32, #tpu.memory_space<vmem>>, %arg10: memref<4x640xbf16, #tpu.memory_space<vmem>>) attributes {dimension_semantics = [#tpu.dimension_semantics<parallel>, #tpu.dimension_semantics<parallel>], iteration_bounds = array<i64: 2, 1>, scalar_prefetch = 0 : i64, scratch_operands = 1 : i64, tpu.core_type = #tpu.core_type<tc>, window_params = [{transform_indices = @transform_0, window_bounds = array<i64: 1, 4, 128>}, {transform_indices = @transform_1, window_bounds = array<i64: 1, 4, 128>}, {transform_indices = @transform_2, window_bounds = array<i64: 1, 4, 128>}, {pipeline_mode = #tpu.pipeline_mode<synchronous>, transform_indices = @transform_3, window_bounds = array<i64: 3, 3, 4, 4>}, {pipeline_mode = #tpu.pipeline_mode<synchronous>, transform_indices = @transform_4, window_bounds = array<i64: 3, 4, 1>}, {pipeline_mode = #tpu.pipeline_mode<synchronous>, transform_indices = @transform_5, window_bounds = array<i64: 3, 3, 4, 4>}, {pipeline_mode = #tpu.pipeline_mode<synchronous>, transform_indices = @transform_6, window_bounds = array<i64: 3, 4, 1>}, {transform_indices = @transform_7, window_bounds = array<i64: 1, 4, 128>}]} {
    %c0_i32 = arith.constant 0 : i32
    %0 = arith.cmpi eq, %arg0, %c0_i32 : i32
    %c0_i32_0 = arith.constant 0 : i32
    %1 = arith.cmpi eq, %arg1, %c0_i32_0 : i32
    %2 = arith.andi %0, %1 : i1
    %3 = arith.extui %2 : i1 to i32
    %c0_i32_1 = arith.constant 0 : i32
    %4 = arith.cmpi ne, %3, %c0_i32_1 : i32
    scf.if %4 {
      %cst_179 = arith.constant 0.000000e+00 : bf16
      %203 = vector.broadcast %cst_179 : bf16 to vector<4x128xbf16>
      %c0_180 = arith.constant 0 : index
      %c0_181 = arith.constant 0 : index
      %204 = vector.load %arg10[%c0_180, %c0_181] : memref<4x640xbf16, #tpu.memory_space<vmem>>, vector<4x128xbf16>
      tpu.vector_store %arg10[%c0_180, %c0_181], %203 {strides = array<i32>} : memref<4x640xbf16, #tpu.memory_space<vmem>>, vector<4x128xbf16>,
      %cst_182 = arith.constant 0.000000e+00 : bf16
      %205 = vector.broadcast %cst_182 : bf16 to vector<4x128xbf16>
      %c0_183 = arith.constant 0 : index
      %c512 = arith.constant 512 : index
      %206 = vector.load %arg10[%c0_183, %c512] : memref<4x640xbf16, #tpu.memory_space<vmem>>, vector<4x128xbf16>
      tpu.vector_store %arg10[%c0_183, %c512], %205 {strides = array<i32>} : memref<4x640xbf16, #tpu.memory_space<vmem>>, vector<4x128xbf16>,
    } else {
    }
    %c0 = arith.constant 0 : index
    %c0_2 = arith.constant 0 : index
    %c0_3 = arith.constant 0 : index
    %5 = vector.load %arg2[%c0, %c0_2, %c0_3] : memref<1x4x128xf32, #tpu.memory_space<vmem>>, vector<1x4x128xf32>
    %6 = vector.shape_cast %5 : vector<1x4x128xf32> to vector<4x128xf32>
    %c0_4 = arith.constant 0 : index
    %c0_5 = arith.constant 0 : index
    %c0_6 = arith.constant 0 : index
    %7 = vector.load %arg3[%c0_4, %c0_5, %c0_6] : memref<1x4x128xf32, #tpu.memory_space<vmem>>, vector<1x4x128xf32>
    %8 = vector.shape_cast %7 : vector<1x4x128xf32> to vector<4x128xf32>
    %c0_7 = arith.constant 0 : index
    %c0_8 = arith.constant 0 : index
    %c0_9 = arith.constant 0 : index
    %9 = vector.load %arg4[%c0_7, %c0_8, %c0_9] : memref<1x4x128xf32, #tpu.memory_space<vmem>>, vector<1x4x128xf32>
    %10 = vector.shape_cast %9 : vector<1x4x128xf32> to vector<4x128xf32>
    %11 = tpu.concatenate %6, %8, %10 in 1 : vector<4x128xf32>, vector<4x128xf32>, vector<4x128xf32> -> vector<4x384xf32>
    %c128_i32 = arith.constant 128 : i32
    %12 = arith.muli %arg1, %c128_i32 : i32
    %c128_i32_10 = arith.constant 128 : i32
    %13 = arith.subi %12, %c128_i32_10 : i32
    %14 = tpu.iota {dimensions = array<i32: 1>} : vector<1x384xi32>
    %15 = vector.broadcast %13 : i32 to vector<1x384xi32>
    %16 = arith.addi %14, %15 : vector<1x384xi32>
    %c0_i32_11 = arith.constant 0 : i32
    %17 = vector.broadcast %c0_i32_11 : i32 to vector<1x384xi32>
    %18 = arith.cmpi sge, %16, %17 : vector<1x384xi32>
    %c16_i32 = arith.constant 16 : i32
    %19 = vector.broadcast %c16_i32 : i32 to vector<1x384xi32>
    %20 = arith.cmpi slt, %16, %19 : vector<1x384xi32>
    %21 = arith.andi %18, %20 : vector<1x384xi1>
    %cst = arith.constant 0.000000e+00 : f32
    %22 = vector.broadcast %cst : f32 to vector<4x384xf32>
    %23 = arith.cmpf oge, %11, %22 : vector<4x384xf32>
    %cst_12 = arith.constant 1.000000e-01 : f32
    %24 = vector.broadcast %cst_12 : f32 to vector<4x384xf32>
    %25 = arith.mulf %24, %11 : vector<4x384xf32>
    %26 = arith.select %23, %11, %25 : vector<4x384xi1>, vector<4x384xf32>
    %cst_13 = arith.constant 0.000000e+00 : f32
    %27 = vector.shape_cast %21 : vector<1x384xi1> to vector<1x384xi1>
    %28 = vector.broadcast %27 : vector<1x384xi1> to vector<4x384xi1>
    %29 = vector.broadcast %cst_13 : f32 to vector<4x384xf32>
    %30 = arith.select %28, %26, %29 : vector<4x384xi1>, vector<4x384xf32>
    %31 = arith.truncf %30 : vector<4x384xf32> to vector<4x384xbf16>
    %c0_14 = arith.constant 0 : index
    %c128 = arith.constant 128 : index
    %32 = vector.load %arg10[%c0_14, %c128] : memref<4x640xbf16, #tpu.memory_space<vmem>>, vector<4x384xbf16>
    tpu.vector_store %arg10[%c0_14, %c128], %31 {strides = array<i32>} : memref<4x640xbf16, #tpu.memory_space<vmem>>, vector<4x384xbf16>,
    %c0_15 = arith.constant 0 : index
    %c127 = arith.constant 127 : index
    %33 = vector.load %arg10[%c0_15, %c127] : memref<4x640xbf16, #tpu.memory_space<vmem>>, vector<4x384xbf16>
    %c0_16 = arith.constant 0 : index
    %c0_17 = arith.constant 0 : index
    %c0_18 = arith.constant 0 : index
    %c0_19 = arith.constant 0 : index
    %34 = vector.load %arg5[%c0_16, %c0_17, %c0_18, %c0_19] : memref<3x3x4x4xbf16, #tpu.memory_space<vmem>>, vector<1x1x4x4xbf16>
    %35 = vector.shape_cast %34 : vector<1x1x4x4xbf16> to vector<4x4xbf16>
    %cst_20 = arith.constant dense<0.000000e+00> : vector<4x384xf32>
    %36 = tpu.matmul %35, %33, %cst_20 {dimension_numbers = #tpu.dot_dimension_numbers<[1], [0], [0], [1], [0, 0, 1, 1], [], []>} : vector<4x4xbf16>, vector<4x384xbf16>, vector<4x384xf32> -> vector<4x384xf32>
    %c0_21 = arith.constant 0 : index
    %c128_22 = arith.constant 128 : index
    %37 = vector.load %arg10[%c0_21, %c128_22] : memref<4x640xbf16, #tpu.memory_space<vmem>>, vector<4x384xbf16>
    %c0_23 = arith.constant 0 : index
    %c1 = arith.constant 1 : index
    %c0_24 = arith.constant 0 : index
    %c0_25 = arith.constant 0 : index
    %38 = vector.load %arg5[%c0_23, %c1, %c0_24, %c0_25] : memref<3x3x4x4xbf16, #tpu.memory_space<vmem>>, vector<1x1x4x4xbf16>
    %39 = vector.shape_cast %38 : vector<1x1x4x4xbf16> to vector<4x4xbf16>
    %cst_26 = arith.constant dense<0.000000e+00> : vector<4x384xf32>
    %40 = tpu.matmul %39, %37, %cst_26 {dimension_numbers = #tpu.dot_dimension_numbers<[1], [0], [0], [1], [0, 0, 1, 1], [], []>} : vector<4x4xbf16>, vector<4x384xbf16>, vector<4x384xf32> -> vector<4x384xf32>
    %41 = arith.addf %36, %40 : vector<4x384xf32>
    %c0_27 = arith.constant 0 : index
    %c129 = arith.constant 129 : index
    %42 = vector.load %arg10[%c0_27, %c129] : memref<4x640xbf16, #tpu.memory_space<vmem>>, vector<4x384xbf16>
    %c0_28 = arith.constant 0 : index
    %c2 = arith.constant 2 : index
    %c0_29 = arith.constant 0 : index
    %c0_30 = arith.constant 0 : index
    %43 = vector.load %arg5[%c0_28, %c2, %c0_29, %c0_30] : memref<3x3x4x4xbf16, #tpu.memory_space<vmem>>, vector<1x1x4x4xbf16>
    %44 = vector.shape_cast %43 : vector<1x1x4x4xbf16> to vector<4x4xbf16>
    %cst_31 = arith.constant dense<0.000000e+00> : vector<4x384xf32>
    %45 = tpu.matmul %44, %42, %cst_31 {dimension_numbers = #tpu.dot_dimension_numbers<[1], [0], [0], [1], [0, 0, 1, 1], [], []>} : vector<4x4xbf16>, vector<4x384xbf16>, vector<4x384xf32> -> vector<4x384xf32>
    %46 = arith.addf %41, %45 : vector<4x384xf32>
    %c0_32 = arith.constant 0 : index
    %c0_33 = arith.constant 0 : index
    %c0_34 = arith.constant 0 : index
    %47 = vector.load %arg6[%c0_32, %c0_33, %c0_34] : memref<3x4x1xf32, #tpu.memory_space<vmem>>, vector<1x4x1xf32>
    %48 = vector.shape_cast %47 : vector<1x4x1xf32> to vector<4x1xf32>
    %49 = vector.broadcast %48 : vector<4x1xf32> to vector<4x384xf32>
    %50 = arith.addf %46, %49 : vector<4x384xf32>
    %cst_35 = arith.constant 0.000000e+00 : f32
    %51 = vector.broadcast %cst_35 : f32 to vector<4x384xf32>
    %52 = arith.cmpf oge, %50, %51 : vector<4x384xf32>
    %cst_36 = arith.constant 1.000000e-01 : f32
    %53 = vector.broadcast %cst_36 : f32 to vector<4x384xf32>
    %54 = arith.mulf %53, %50 : vector<4x384xf32>
    %55 = arith.select %52, %50, %54 : vector<4x384xi1>, vector<4x384xf32>
    %cst_37 = arith.constant 0.000000e+00 : f32
    %56 = vector.shape_cast %21 : vector<1x384xi1> to vector<1x384xi1>
    %57 = vector.broadcast %56 : vector<1x384xi1> to vector<4x384xi1>
    %58 = vector.broadcast %cst_37 : f32 to vector<4x384xf32>
    %59 = arith.select %57, %55, %58 : vector<4x384xi1>, vector<4x384xf32>
    %60 = arith.truncf %59 : vector<4x384xf32> to vector<4x384xbf16>
    %c0_38 = arith.constant 0 : index
    %c128_39 = arith.constant 128 : index
    %61 = vector.load %arg10[%c0_38, %c128_39] : memref<4x640xbf16, #tpu.memory_space<vmem>>, vector<4x384xbf16>
    tpu.vector_store %arg10[%c0_38, %c128_39], %60 {strides = array<i32>} : memref<4x640xbf16, #tpu.memory_space<vmem>>, vector<4x384xbf16>,
    %c0_40 = arith.constant 0 : index
    %c127_41 = arith.constant 127 : index
    %62 = vector.load %arg10[%c0_40, %c127_41] : memref<4x640xbf16, #tpu.memory_space<vmem>>, vector<4x384xbf16>
    %c0_42 = arith.constant 0 : index
    %c0_43 = arith.constant 0 : index
    %c0_44 = arith.constant 0 : index
    %c0_45 = arith.constant 0 : index
    %63 = vector.load %arg7[%c0_42, %c0_43, %c0_44, %c0_45] : memref<3x3x4x4xbf16, #tpu.memory_space<vmem>>, vector<1x1x4x4xbf16>
    %64 = vector.shape_cast %63 : vector<1x1x4x4xbf16> to vector<4x4xbf16>
    %cst_46 = arith.constant dense<0.000000e+00> : vector<4x384xf32>
    %65 = tpu.matmul %64, %62, %cst_46 {dimension_numbers = #tpu.dot_dimension_numbers<[1], [0], [0], [1], [0, 0, 1, 1], [], []>} : vector<4x4xbf16>, vector<4x384xbf16>, vector<4x384xf32> -> vector<4x384xf32>
    %c0_47 = arith.constant 0 : index
    %c128_48 = arith.constant 128 : index
    %66 = vector.load %arg10[%c0_47, %c128_48] : memref<4x640xbf16, #tpu.memory_space<vmem>>, vector<4x384xbf16>
    %c0_49 = arith.constant 0 : index
    %c1_50 = arith.constant 1 : index
    %c0_51 = arith.constant 0 : index
    %c0_52 = arith.constant 0 : index
    %67 = vector.load %arg7[%c0_49, %c1_50, %c0_51, %c0_52] : memref<3x3x4x4xbf16, #tpu.memory_space<vmem>>, vector<1x1x4x4xbf16>
    %68 = vector.shape_cast %67 : vector<1x1x4x4xbf16> to vector<4x4xbf16>
    %cst_53 = arith.constant dense<0.000000e+00> : vector<4x384xf32>
    %69 = tpu.matmul %68, %66, %cst_53 {dimension_numbers = #tpu.dot_dimension_numbers<[1], [0], [0], [1], [0, 0, 1, 1], [], []>} : vector<4x4xbf16>, vector<4x384xbf16>, vector<4x384xf32> -> vector<4x384xf32>
    %70 = arith.addf %65, %69 : vector<4x384xf32>
    %c0_54 = arith.constant 0 : index
    %c129_55 = arith.constant 129 : index
    %71 = vector.load %arg10[%c0_54, %c129_55] : memref<4x640xbf16, #tpu.memory_space<vmem>>, vector<4x384xbf16>
    %c0_56 = arith.constant 0 : index
    %c2_57 = arith.constant 2 : index
    %c0_58 = arith.constant 0 : index
    %c0_59 = arith.constant 0 : index
    %72 = vector.load %arg7[%c0_56, %c2_57, %c0_58, %c0_59] : memref<3x3x4x4xbf16, #tpu.memory_space<vmem>>, vector<1x1x4x4xbf16>
    %73 = vector.shape_cast %72 : vector<1x1x4x4xbf16> to vector<4x4xbf16>
    %cst_60 = arith.constant dense<0.000000e+00> : vector<4x384xf32>
    %74 = tpu.matmul %73, %71, %cst_60 {dimension_numbers = #tpu.dot_dimension_numbers<[1], [0], [0], [1], [0, 0, 1, 1], [], []>} : vector<4x4xbf16>, vector<4x384xbf16>, vector<4x384xf32> -> vector<4x384xf32>
    %75 = arith.addf %70, %74 : vector<4x384xf32>
    %c0_61 = arith.constant 0 : index
    %c0_62 = arith.constant 0 : index
    %c0_63 = arith.constant 0 : index
    %76 = vector.load %arg8[%c0_61, %c0_62, %c0_63] : memref<3x4x1xf32, #tpu.memory_space<vmem>>, vector<1x4x1xf32>
    %77 = vector.shape_cast %76 : vector<1x4x1xf32> to vector<4x1xf32>
    %78 = vector.broadcast %77 : vector<4x1xf32> to vector<4x384xf32>
    %79 = arith.addf %75, %78 : vector<4x384xf32>
    %80 = arith.addf %79, %11 : vector<4x384xf32>
    %cst_64 = arith.constant 0.000000e+00 : f32
    %81 = vector.broadcast %cst_64 : f32 to vector<4x384xf32>
    %82 = arith.cmpf oge, %80, %81 : vector<4x384xf32>
    %cst_65 = arith.constant 1.000000e-01 : f32
    %83 = vector.broadcast %cst_65 : f32 to vector<4x384xf32>
    %84 = arith.mulf %83, %80 : vector<4x384xf32>
    %85 = arith.select %82, %80, %84 : vector<4x384xi1>, vector<4x384xf32>
    %cst_66 = arith.constant 0.000000e+00 : f32
    %86 = vector.shape_cast %21 : vector<1x384xi1> to vector<1x384xi1>
    %87 = vector.broadcast %86 : vector<1x384xi1> to vector<4x384xi1>
    %88 = vector.broadcast %cst_66 : f32 to vector<4x384xf32>
    %89 = arith.select %87, %85, %88 : vector<4x384xi1>, vector<4x384xf32>
    %90 = arith.truncf %89 : vector<4x384xf32> to vector<4x384xbf16>
    %c0_67 = arith.constant 0 : index
    %c128_68 = arith.constant 128 : index
    %91 = vector.load %arg10[%c0_67, %c128_68] : memref<4x640xbf16, #tpu.memory_space<vmem>>, vector<4x384xbf16>
    tpu.vector_store %arg10[%c0_67, %c128_68], %90 {strides = array<i32>} : memref<4x640xbf16, #tpu.memory_space<vmem>>, vector<4x384xbf16>,
    %c0_69 = arith.constant 0 : index
    %c125 = arith.constant 125 : index
    %92 = vector.load %arg10[%c0_69, %c125] : memref<4x640xbf16, #tpu.memory_space<vmem>>, vector<4x384xbf16>
    %c1_70 = arith.constant 1 : index
    %c0_71 = arith.constant 0 : index
    %c0_72 = arith.constant 0 : index
    %c0_73 = arith.constant 0 : index
    %93 = vector.load %arg5[%c1_70, %c0_71, %c0_72, %c0_73] : memref<3x3x4x4xbf16, #tpu.memory_space<vmem>>, vector<1x1x4x4xbf16>
    %94 = vector.shape_cast %93 : vector<1x1x4x4xbf16> to vector<4x4xbf16>
    %cst_74 = arith.constant dense<0.000000e+00> : vector<4x384xf32>
    %95 = tpu.matmul %94, %92, %cst_74 {dimension_numbers = #tpu.dot_dimension_numbers<[1], [0], [0], [1], [0, 0, 1, 1], [], []>} : vector<4x4xbf16>, vector<4x384xbf16>, vector<4x384xf32> -> vector<4x384xf32>
    %c0_75 = arith.constant 0 : index
    %c128_76 = arith.constant 128 : index
    %96 = vector.load %arg10[%c0_75, %c128_76] : memref<4x640xbf16, #tpu.memory_space<vmem>>, vector<4x384xbf16>
    %c1_77 = arith.constant 1 : index
    %c1_78 = arith.constant 1 : index
    %c0_79 = arith.constant 0 : index
    %c0_80 = arith.constant 0 : index
    %97 = vector.load %arg5[%c1_77, %c1_78, %c0_79, %c0_80] : memref<3x3x4x4xbf16, #tpu.memory_space<vmem>>, vector<1x1x4x4xbf16>
    %98 = vector.shape_cast %97 : vector<1x1x4x4xbf16> to vector<4x4xbf16>
    %cst_81 = arith.constant dense<0.000000e+00> : vector<4x384xf32>
    %99 = tpu.matmul %98, %96, %cst_81 {dimension_numbers = #tpu.dot_dimension_numbers<[1], [0], [0], [1], [0, 0, 1, 1], [], []>} : vector<4x4xbf16>, vector<4x384xbf16>, vector<4x384xf32> -> vector<4x384xf32>
    %100 = arith.addf %95, %99 : vector<4x384xf32>
    %c0_82 = arith.constant 0 : index
    %c131 = arith.constant 131 : index
    %101 = vector.load %arg10[%c0_82, %c131] : memref<4x640xbf16, #tpu.memory_space<vmem>>, vector<4x384xbf16>
    %c1_83 = arith.constant 1 : index
    %c2_84 = arith.constant 2 : index
    %c0_85 = arith.constant 0 : index
    %c0_86 = arith.constant 0 : index
    %102 = vector.load %arg5[%c1_83, %c2_84, %c0_85, %c0_86] : memref<3x3x4x4xbf16, #tpu.memory_space<vmem>>, vector<1x1x4x4xbf16>
    %103 = vector.shape_cast %102 : vector<1x1x4x4xbf16> to vector<4x4xbf16>
    %cst_87 = arith.constant dense<0.000000e+00> : vector<4x384xf32>
    %104 = tpu.matmul %103, %101, %cst_87 {dimension_numbers = #tpu.dot_dimension_numbers<[1], [0], [0], [1], [0, 0, 1, 1], [], []>} : vector<4x4xbf16>, vector<4x384xbf16>, vector<4x384xf32> -> vector<4x384xf32>
    %105 = arith.addf %100, %104 : vector<4x384xf32>
    %c1_88 = arith.constant 1 : index
    %c0_89 = arith.constant 0 : index
    %c0_90 = arith.constant 0 : index
    %106 = vector.load %arg6[%c1_88, %c0_89, %c0_90] : memref<3x4x1xf32, #tpu.memory_space<vmem>>, vector<1x4x1xf32>
    %107 = vector.shape_cast %106 : vector<1x4x1xf32> to vector<4x1xf32>
    %108 = vector.broadcast %107 : vector<4x1xf32> to vector<4x384xf32>
    %109 = arith.addf %105, %108 : vector<4x384xf32>
    %cst_91 = arith.constant 0.000000e+00 : f32
    %110 = vector.broadcast %cst_91 : f32 to vector<4x384xf32>
    %111 = arith.cmpf oge, %109, %110 : vector<4x384xf32>
    %cst_92 = arith.constant 1.000000e-01 : f32
    %112 = vector.broadcast %cst_92 : f32 to vector<4x384xf32>
    %113 = arith.mulf %112, %109 : vector<4x384xf32>
    %114 = arith.select %111, %109, %113 : vector<4x384xi1>, vector<4x384xf32>
    %cst_93 = arith.constant 0.000000e+00 : f32
    %115 = vector.shape_cast %21 : vector<1x384xi1> to vector<1x384xi1>
    %116 = vector.broadcast %115 : vector<1x384xi1> to vector<4x384xi1>
    %117 = vector.broadcast %cst_93 : f32 to vector<4x384xf32>
    %118 = arith.select %116, %114, %117 : vector<4x384xi1>, vector<4x384xf32>
    %119 = arith.truncf %118 : vector<4x384xf32> to vector<4x384xbf16>
    %c0_94 = arith.constant 0 : index
    %c128_95 = arith.constant 128 : index
    %120 = vector.load %arg10[%c0_94, %c128_95] : memref<4x640xbf16, #tpu.memory_space<vmem>>, vector<4x384xbf16>
    tpu.vector_store %arg10[%c0_94, %c128_95], %119 {strides = array<i32>} : memref<4x640xbf16, #tpu.memory_space<vmem>>, vector<4x384xbf16>,
    %c0_96 = arith.constant 0 : index
    %c125_97 = arith.constant 125 : index
    %121 = vector.load %arg10[%c0_96, %c125_97] : memref<4x640xbf16, #tpu.memory_space<vmem>>, vector<4x384xbf16>
    %c1_98 = arith.constant 1 : index
    %c0_99 = arith.constant 0 : index
    %c0_100 = arith.constant 0 : index
    %c0_101 = arith.constant 0 : index
    %122 = vector.load %arg7[%c1_98, %c0_99, %c0_100, %c0_101] : memref<3x3x4x4xbf16, #tpu.memory_space<vmem>>, vector<1x1x4x4xbf16>
    %123 = vector.shape_cast %122 : vector<1x1x4x4xbf16> to vector<4x4xbf16>
    %cst_102 = arith.constant dense<0.000000e+00> : vector<4x384xf32>
    %124 = tpu.matmul %123, %121, %cst_102 {dimension_numbers = #tpu.dot_dimension_numbers<[1], [0], [0], [1], [0, 0, 1, 1], [], []>} : vector<4x4xbf16>, vector<4x384xbf16>, vector<4x384xf32> -> vector<4x384xf32>
    %c0_103 = arith.constant 0 : index
    %c128_104 = arith.constant 128 : index
    %125 = vector.load %arg10[%c0_103, %c128_104] : memref<4x640xbf16, #tpu.memory_space<vmem>>, vector<4x384xbf16>
    %c1_105 = arith.constant 1 : index
    %c1_106 = arith.constant 1 : index
    %c0_107 = arith.constant 0 : index
    %c0_108 = arith.constant 0 : index
    %126 = vector.load %arg7[%c1_105, %c1_106, %c0_107, %c0_108] : memref<3x3x4x4xbf16, #tpu.memory_space<vmem>>, vector<1x1x4x4xbf16>
    %127 = vector.shape_cast %126 : vector<1x1x4x4xbf16> to vector<4x4xbf16>
    %cst_109 = arith.constant dense<0.000000e+00> : vector<4x384xf32>
    %128 = tpu.matmul %127, %125, %cst_109 {dimension_numbers = #tpu.dot_dimension_numbers<[1], [0], [0], [1], [0, 0, 1, 1], [], []>} : vector<4x4xbf16>, vector<4x384xbf16>, vector<4x384xf32> -> vector<4x384xf32>
    %129 = arith.addf %124, %128 : vector<4x384xf32>
    %c0_110 = arith.constant 0 : index
    %c131_111 = arith.constant 131 : index
    %130 = vector.load %arg10[%c0_110, %c131_111] : memref<4x640xbf16, #tpu.memory_space<vmem>>, vector<4x384xbf16>
    %c1_112 = arith.constant 1 : index
    %c2_113 = arith.constant 2 : index
    %c0_114 = arith.constant 0 : index
    %c0_115 = arith.constant 0 : index
    %131 = vector.load %arg7[%c1_112, %c2_113, %c0_114, %c0_115] : memref<3x3x4x4xbf16, #tpu.memory_space<vmem>>, vector<1x1x4x4xbf16>
    %132 = vector.shape_cast %131 : vector<1x1x4x4xbf16> to vector<4x4xbf16>
    %cst_116 = arith.constant dense<0.000000e+00> : vector<4x384xf32>
    %133 = tpu.matmul %132, %130, %cst_116 {dimension_numbers = #tpu.dot_dimension_numbers<[1], [0], [0], [1], [0, 0, 1, 1], [], []>} : vector<4x4xbf16>, vector<4x384xbf16>, vector<4x384xf32> -> vector<4x384xf32>
    %134 = arith.addf %129, %133 : vector<4x384xf32>
    %c1_117 = arith.constant 1 : index
    %c0_118 = arith.constant 0 : index
    %c0_119 = arith.constant 0 : index
    %135 = vector.load %arg8[%c1_117, %c0_118, %c0_119] : memref<3x4x1xf32, #tpu.memory_space<vmem>>, vector<1x4x1xf32>
    %136 = vector.shape_cast %135 : vector<1x4x1xf32> to vector<4x1xf32>
    %137 = vector.broadcast %136 : vector<4x1xf32> to vector<4x384xf32>
    %138 = arith.addf %134, %137 : vector<4x384xf32>
    %139 = arith.addf %138, %80 : vector<4x384xf32>
    %cst_120 = arith.constant 0.000000e+00 : f32
    %140 = vector.broadcast %cst_120 : f32 to vector<4x384xf32>
    %141 = arith.cmpf oge, %139, %140 : vector<4x384xf32>
    %cst_121 = arith.constant 1.000000e-01 : f32
    %142 = vector.broadcast %cst_121 : f32 to vector<4x384xf32>
    %143 = arith.mulf %142, %139 : vector<4x384xf32>
    %144 = arith.select %141, %139, %143 : vector<4x384xi1>, vector<4x384xf32>
    %cst_122 = arith.constant 0.000000e+00 : f32
    %145 = vector.shape_cast %21 : vector<1x384xi1> to vector<1x384xi1>
    %146 = vector.broadcast %145 : vector<1x384xi1> to vector<4x384xi1>
    %147 = vector.broadcast %cst_122 : f32 to vector<4x384xf32>
    %148 = arith.select %146, %144, %147 : vector<4x384xi1>, vector<4x384xf32>
    %149 = arith.truncf %148 : vector<4x384xf32> to vector<4x384xbf16>
    %c0_123 = arith.constant 0 : index
    %c128_124 = arith.constant 128 : index
    %150 = vector.load %arg10[%c0_123, %c128_124] : memref<4x640xbf16, #tpu.memory_space<vmem>>, vector<4x384xbf16>
    tpu.vector_store %arg10[%c0_123, %c128_124], %149 {strides = array<i32>} : memref<4x640xbf16, #tpu.memory_space<vmem>>, vector<4x384xbf16>,
    %c0_125 = arith.constant 0 : index
    %c123 = arith.constant 123 : index
    %151 = vector.load %arg10[%c0_125, %c123] : memref<4x640xbf16, #tpu.memory_space<vmem>>, vector<4x384xbf16>
    %c2_126 = arith.constant 2 : index
    %c0_127 = arith.constant 0 : index
    %c0_128 = arith.constant 0 : index
    %c0_129 = arith.constant 0 : index
    %152 = vector.load %arg5[%c2_126, %c0_127, %c0_128, %c0_129] : memref<3x3x4x4xbf16, #tpu.memory_space<vmem>>, vector<1x1x4x4xbf16>
    %153 = vector.shape_cast %152 : vector<1x1x4x4xbf16> to vector<4x4xbf16>
    %cst_130 = arith.constant dense<0.000000e+00> : vector<4x384xf32>
    %154 = tpu.matmul %153, %151, %cst_130 {dimension_numbers = #tpu.dot_dimension_numbers<[1], [0], [0], [1], [0, 0, 1, 1], [], []>} : vector<4x4xbf16>, vector<4x384xbf16>, vector<4x384xf32> -> vector<4x384xf32>
    %c0_131 = arith.constant 0 : index
    %c128_132 = arith.constant 128 : index
    %155 = vector.load %arg10[%c0_131, %c128_132] : memref<4x640xbf16, #tpu.memory_space<vmem>>, vector<4x384xbf16>
    %c2_133 = arith.constant 2 : index
    %c1_134 = arith.constant 1 : index
    %c0_135 = arith.constant 0 : index
    %c0_136 = arith.constant 0 : index
    %156 = vector.load %arg5[%c2_133, %c1_134, %c0_135, %c0_136] : memref<3x3x4x4xbf16, #tpu.memory_space<vmem>>, vector<1x1x4x4xbf16>
    %157 = vector.shape_cast %156 : vector<1x1x4x4xbf16> to vector<4x4xbf16>
    %cst_137 = arith.constant dense<0.000000e+00> : vector<4x384xf32>
    %158 = tpu.matmul %157, %155, %cst_137 {dimension_numbers = #tpu.dot_dimension_numbers<[1], [0], [0], [1], [0, 0, 1, 1], [], []>} : vector<4x4xbf16>, vector<4x384xbf16>, vector<4x384xf32> -> vector<4x384xf32>
    %159 = arith.addf %154, %158 : vector<4x384xf32>
    %c0_138 = arith.constant 0 : index
    %c133 = arith.constant 133 : index
    %160 = vector.load %arg10[%c0_138, %c133] : memref<4x640xbf16, #tpu.memory_space<vmem>>, vector<4x384xbf16>
    %c2_139 = arith.constant 2 : index
    %c2_140 = arith.constant 2 : index
    %c0_141 = arith.constant 0 : index
    %c0_142 = arith.constant 0 : index
    %161 = vector.load %arg5[%c2_139, %c2_140, %c0_141, %c0_142] : memref<3x3x4x4xbf16, #tpu.memory_space<vmem>>, vector<1x1x4x4xbf16>
    %162 = vector.shape_cast %161 : vector<1x1x4x4xbf16> to vector<4x4xbf16>
    %cst_143 = arith.constant dense<0.000000e+00> : vector<4x384xf32>
    %163 = tpu.matmul %162, %160, %cst_143 {dimension_numbers = #tpu.dot_dimension_numbers<[1], [0], [0], [1], [0, 0, 1, 1], [], []>} : vector<4x4xbf16>, vector<4x384xbf16>, vector<4x384xf32> -> vector<4x384xf32>
    %164 = arith.addf %159, %163 : vector<4x384xf32>
    %c2_144 = arith.constant 2 : index
    %c0_145 = arith.constant 0 : index
    %c0_146 = arith.constant 0 : index
    %165 = vector.load %arg6[%c2_144, %c0_145, %c0_146] : memref<3x4x1xf32, #tpu.memory_space<vmem>>, vector<1x4x1xf32>
    %166 = vector.shape_cast %165 : vector<1x4x1xf32> to vector<4x1xf32>
    %167 = vector.broadcast %166 : vector<4x1xf32> to vector<4x384xf32>
    %168 = arith.addf %164, %167 : vector<4x384xf32>
    %cst_147 = arith.constant 0.000000e+00 : f32
    %169 = vector.broadcast %cst_147 : f32 to vector<4x384xf32>
    %170 = arith.cmpf oge, %168, %169 : vector<4x384xf32>
    %cst_148 = arith.constant 1.000000e-01 : f32
    %171 = vector.broadcast %cst_148 : f32 to vector<4x384xf32>
    %172 = arith.mulf %171, %168 : vector<4x384xf32>
    %173 = arith.select %170, %168, %172 : vector<4x384xi1>, vector<4x384xf32>
    %cst_149 = arith.constant 0.000000e+00 : f32
    %174 = vector.shape_cast %21 : vector<1x384xi1> to vector<1x384xi1>
    %175 = vector.broadcast %174 : vector<1x384xi1> to vector<4x384xi1>
    %176 = vector.broadcast %cst_149 : f32 to vector<4x384xf32>
    %177 = arith.select %175, %173, %176 : vector<4x384xi1>, vector<4x384xf32>
    %178 = arith.truncf %177 : vector<4x384xf32> to vector<4x384xbf16>
    %c0_150 = arith.constant 0 : index
    %c128_151 = arith.constant 128 : index
    %179 = vector.load %arg10[%c0_150, %c128_151] : memref<4x640xbf16, #tpu.memory_space<vmem>>, vector<4x384xbf16>
    tpu.vector_store %arg10[%c0_150, %c128_151], %178 {strides = array<i32>} : memref<4x640xbf16, #tpu.memory_space<vmem>>, vector<4x384xbf16>,
    %c0_152 = arith.constant 0 : index
    %c123_153 = arith.constant 123 : index
    %180 = vector.load %arg10[%c0_152, %c123_153] : memref<4x640xbf16, #tpu.memory_space<vmem>>, vector<4x384xbf16>
    %c2_154 = arith.constant 2 : index
    %c0_155 = arith.constant 0 : index
    %c0_156 = arith.constant 0 : index
    %c0_157 = arith.constant 0 : index
    %181 = vector.load %arg7[%c2_154, %c0_155, %c0_156, %c0_157] : memref<3x3x4x4xbf16, #tpu.memory_space<vmem>>, vector<1x1x4x4xbf16>
    %182 = vector.shape_cast %181 : vector<1x1x4x4xbf16> to vector<4x4xbf16>
    %cst_158 = arith.constant dense<0.000000e+00> : vector<4x384xf32>
    %183 = tpu.matmul %182, %180, %cst_158 {dimension_numbers = #tpu.dot_dimension_numbers<[1], [0], [0], [1], [0, 0, 1, 1], [], []>} : vector<4x4xbf16>, vector<4x384xbf16>, vector<4x384xf32> -> vector<4x384xf32>
    %c0_159 = arith.constant 0 : index
    %c128_160 = arith.constant 128 : index
    %184 = vector.load %arg10[%c0_159, %c128_160] : memref<4x640xbf16, #tpu.memory_space<vmem>>, vector<4x384xbf16>
    %c2_161 = arith.constant 2 : index
    %c1_162 = arith.constant 1 : index
    %c0_163 = arith.constant 0 : index
    %c0_164 = arith.constant 0 : index
    %185 = vector.load %arg7[%c2_161, %c1_162, %c0_163, %c0_164] : memref<3x3x4x4xbf16, #tpu.memory_space<vmem>>, vector<1x1x4x4xbf16>
    %186 = vector.shape_cast %185 : vector<1x1x4x4xbf16> to vector<4x4xbf16>
    %cst_165 = arith.constant dense<0.000000e+00> : vector<4x384xf32>
    %187 = tpu.matmul %186, %184, %cst_165 {dimension_numbers = #tpu.dot_dimension_numbers<[1], [0], [0], [1], [0, 0, 1, 1], [], []>} : vector<4x4xbf16>, vector<4x384xbf16>, vector<4x384xf32> -> vector<4x384xf32>
    %188 = arith.addf %183, %187 : vector<4x384xf32>
    %c0_166 = arith.constant 0 : index
    %c133_167 = arith.constant 133 : index
    %189 = vector.load %arg10[%c0_166, %c133_167] : memref<4x640xbf16, #tpu.memory_space<vmem>>, vector<4x384xbf16>
    %c2_168 = arith.constant 2 : index
    %c2_169 = arith.constant 2 : index
    %c0_170 = arith.constant 0 : index
    %c0_171 = arith.constant 0 : index
    %190 = vector.load %arg7[%c2_168, %c2_169, %c0_170, %c0_171] : memref<3x3x4x4xbf16, #tpu.memory_space<vmem>>, vector<1x1x4x4xbf16>
    %191 = vector.shape_cast %190 : vector<1x1x4x4xbf16> to vector<4x4xbf16>
    %cst_172 = arith.constant dense<0.000000e+00> : vector<4x384xf32>
    %192 = tpu.matmul %191, %189, %cst_172 {dimension_numbers = #tpu.dot_dimension_numbers<[1], [0], [0], [1], [0, 0, 1, 1], [], []>} : vector<4x4xbf16>, vector<4x384xbf16>, vector<4x384xf32> -> vector<4x384xf32>
    %193 = arith.addf %188, %192 : vector<4x384xf32>
    %c2_173 = arith.constant 2 : index
    %c0_174 = arith.constant 0 : index
    %c0_175 = arith.constant 0 : index
    %194 = vector.load %arg8[%c2_173, %c0_174, %c0_175] : memref<3x4x1xf32, #tpu.memory_space<vmem>>, vector<1x4x1xf32>
    %195 = vector.shape_cast %194 : vector<1x4x1xf32> to vector<4x1xf32>
    %196 = vector.broadcast %195 : vector<4x1xf32> to vector<4x384xf32>
    %197 = arith.addf %193, %196 : vector<4x384xf32>
    %198 = arith.addf %197, %139 : vector<4x384xf32>
    %199 = vector.extract_strided_slice %198 {offsets = [0, 128], sizes = [4, 128], strides = [1, 1]} : vector<4x384xf32> to vector<4x128xf32>
    %c0_176 = arith.constant 0 : index
    %c0_177 = arith.constant 0 : index
    %c0_178 = arith.constant 0 : index
    %200 = vector.load %arg9[%c0_176, %c0_177, %c0_178] : memref<1x4x128xf32, #tpu.memory_space<vmem>>, vector<1x4x128xf32>
    %201 = vector.shape_cast %200 : vector<1x4x128xf32> to vector<4x128xf32>
    %202 = vector.shape_cast %199 : vector<4x128xf32> to vector<1x4x128xf32>
    tpu.vector_store %arg9[%c0_176, %c0_177, %c0_178], %202 {strides = array<i32>} : memref<1x4x128xf32, #tpu.memory_space<vmem>>, vector<1x4x128xf32>,
    return
  }
  func.func @transform_0(%arg0: i32, %arg1: i32) -> (i32, i32, i32) {
    %c1_i32 = arith.constant 1 : i32
    %0 = arith.muli %arg1, %c1_i32 : i32
    %c1_i32_0 = arith.constant 1 : i32
    %1 = arith.subi %0, %c1_i32_0 : i32
    %c0_i32 = arith.constant 0 : i32
    %2 = arith.maxsi %1, %c0_i32 : i32
    %c0_i32_1 = arith.constant 0 : i32
    %c0_i32_2 = arith.constant 0 : i32
    return %arg0, %c0_i32_1, %2 : i32, i32, i32
  }
  func.func @transform_1(%arg0: i32, %arg1: i32) -> (i32, i32, i32) {
    %c0_i32 = arith.constant 0 : i32
    %c0_i32_0 = arith.constant 0 : i32
    return %arg0, %c0_i32, %arg1 : i32, i32, i32
  }
  func.func @transform_2(%arg0: i32, %arg1: i32) -> (i32, i32, i32) {
    %c1_i32 = arith.constant 1 : i32
    %0 = arith.addi %arg1, %c1_i32 : i32
    %c1_i32_0 = arith.constant 1 : i32
    %1 = arith.muli %0, %c1_i32_0 : i32
    %c0_i32 = arith.constant 0 : i32
    %2 = arith.minsi %1, %c0_i32 : i32
    %c0_i32_1 = arith.constant 0 : i32
    %c0_i32_2 = arith.constant 0 : i32
    return %arg0, %c0_i32_1, %2 : i32, i32, i32
  }
  func.func @transform_3(%arg0: i32, %arg1: i32) -> (i32, i32, i32, i32) {
    %c0_i32 = arith.constant 0 : i32
    %c0_i32_0 = arith.constant 0 : i32
    %c0_i32_1 = arith.constant 0 : i32
    %c0_i32_2 = arith.constant 0 : i32
    %c0_i32_3 = arith.constant 0 : i32
    return %c0_i32, %c0_i32_0, %c0_i32_1, %c0_i32_2 : i32, i32, i32, i32
  }
  func.func @transform_4(%arg0: i32, %arg1: i32) -> (i32, i32, i32) {
    %c0_i32 = arith.constant 0 : i32
    %c0_i32_0 = arith.constant 0 : i32
    %c0_i32_1 = arith.constant 0 : i32
    %c0_i32_2 = arith.constant 0 : i32
    return %c0_i32, %c0_i32_0, %c0_i32_1 : i32, i32, i32
  }
  func.func @transform_5(%arg0: i32, %arg1: i32) -> (i32, i32, i32, i32) {
    %c0_i32 = arith.constant 0 : i32
    %c0_i32_0 = arith.constant 0 : i32
    %c0_i32_1 = arith.constant 0 : i32
    %c0_i32_2 = arith.constant 0 : i32
    %c0_i32_3 = arith.constant 0 : i32
    return %c0_i32, %c0_i32_0, %c0_i32_1, %c0_i32_2 : i32, i32, i32, i32
  }
  func.func @transform_6(%arg0: i32, %arg1: i32) -> (i32, i32, i32) {
    %c0_i32 = arith.constant 0 : i32
    %c0_i32_0 = arith.constant 0 : i32
    %c0_i32_1 = arith.constant 0 : i32
    %c0_i32_2 = arith.constant 0 : i32
    return %c0_i32, %c0_i32_0, %c0_i32_1 : i32, i32, i32
  }
  func.func @transform_7(%arg0: i32, %arg1: i32) -> (i32, i32, i32) {
    %c0_i32 = arith.constant 0 : i32
    %c0_i32_0 = arith.constant 0 : i32
    return %arg0, %c0_i32, %arg1 : i32, i32, i32
  }
}

</mosaic_0001>

<bundles_post_ra>
// kernel: tpu_custom_call.1
= control target key start
LH: loop header
LB: loop body
LE: loop exit
PB: predicated region body
PF: predicated region fallthrough
CT: control target
= control target key end

     0   :  { %s2841_s0 = inlined_call_operand.vmem [shape: f32[2,4,128], index: 0, kind: input, shape index: {}]   ;;  %s2842_s1 = inlined_call_operand.hbm [shape: f32[2,4,128], index: 1, kind: input, shape index: {}]   ;;  %s2843_s2 = inlined_call_operand.hbm [shape: f32[2,4,128], index: 2, kind: input, shape index: {}]   ;;  %s2844_s3 = inlined_call_operand.vmem [shape: bf16[3,3,4,4], index: 3, kind: input, shape index: {}]   ;;  %s2845_s4 = inlined_call_operand.vmem [shape: f32[3,4,1], index: 4, kind: input, shape index: {}]   ;;  %s2846_s5 = inlined_call_operand.hbm [shape: bf16[3,3,4,4], index: 5, kind: input, shape index: {}]   ;;  %s2847_s6 = inlined_call_operand.vmem [shape: f32[3,4,1], index: 6, kind: input, shape index: {}]   ;;  %s2848_s7 = inlined_call_operand.hbm [shape: f32[2,4,128], index: 7, kind: output, shape index: {}]  }
   0x1   :  { %2854 = sst [smem:[#allocation20_spill]] %s2846_s5 }
   0x2   :  { %12 = vsyncpa [#allocation4], 0 }
   0x3   :  { %14 = vsyncpa [#allocation4 + $0x1], 0 }
   0x4   :  { %15 = vsyncpa [#allocation7], 0 }
   0x5   :  { %17 = vsyncpa [#allocation7 + $0x1], 0 }
   0x6   :  { %18 = vsyncpa [#allocation5], 0 }
   0x7   :  { %20 = vsyncpa [#allocation5 + $0x1], 0  ;;  %s2399_s23 = smov 0   ;;  %s2401_s24 = smov 0  }
   0x8   :  { %s2403_s25 = smov 0   ;;  %s2405_s26 = smov 0  }
   0x9   :  { %s2407_s27 = smov 0   ;;  %s2409_s28 = smov 0  }
   0xa LB: > { %2855 = sst [smem:[#allocation14_spill]] %s2324_s23  ;;  %s2430_s29 = sadd.s32 4294967295, %s2344_s28   ;;  %s2344_s28 = sphi %s2409_s28, %s26_s28   ;;  %s2340_s27 = sphi %s2407_s27, %s2872_s27   ;;  %s2336_s26 = sphi %s2405_s26, %s2871_s26   ;;  %s2332_s25 = sphi %s2403_s25, %s2870_s25   ;;  %s2328_s24 = sphi %s2401_s24, %s2874_s24   ;;  %s2324_s23 = sphi %s2399_s23, %s2873_s23  }
   0xb   : > { %2856 = sst [smem:[#allocation15_spill]] %s2332_s25  ;;  %p1992_p0 = scmp.ge.s32.totalorder %s2344_s28, 1 }
   0xc   : > { %2857 = sst [smem:[#allocation16_spill]] %s2340_s27  ;;  %p95_p1 = scmp.eq.s32.totalorder %s2430_s29, 0 }
   0xd   : > { %p251_p2 = scmp.lt.s32.totalorder %s2344_s28, 3  ;;  %s2858_s5 = sld [smem:[#allocation20_spill]] }
   0xe   : > { %s2346_s11 = smov [#allocation8]   ;;  %p1994_p6 = scmp.ge.s32.totalorder %s2344_s28, 2 }
   0xf   : > { %p2438_p3 = pnand %p1992_p0, %p251_p2  ;;  %s270_s12 = sshll.u32 %s2346_s11, 4  ;;  %s271_s12 = int_to_ptr.vmem [resolvable:$true] %s270_s12 }
  0x10   : > { %s2347_s13 = smov 32   ;;  %s2348_s14 = smov 2  }
  0x11   : > { %p2081_p4 = pneg %p2438_p3  ;;  %s1991_s15 = sadd.s32 4294967294, %s2344_s28  }
  0x12   : > { %s38_s16 = sadd.s32 1, %s2340_s27  ;;  %s81_s17 = sadd.s32 1, %s2332_s25 }
  0x13   : > { %s268_s9 = sshll.u32 %s2858_s5, 4  ;;  %p2082_p5 = pnand %p2081_p4, %p95_p1  ;;  %s269_s9 = int_to_ptr.hbm [resolvable:$true] %s268_s9 }
  0x14   : > { %p40_p7 = scmp.ge.s32.totalorder %s38_s16, 2  ;;  %p88_p8 = scmp.ne.s32.totalorder %s2332_s25, %s2328_s24 }
  0x15   : > { %2084 = dma.hbm_to_vmem [thread:$0]  (!%p2082_p5), %s269_s9, 288, %s271_s12, [#allocation7], %s2347_s13, %s2347_s13, %s2348_s14  }
  0x16   : > { %p89_p9 = scmp.eq.s32.totalorder %s2344_s28, 0  ;;  %p94_p10 = scmp.ne.s32.totalorder %s2328_s24, %s2324_s23 }
  0x17   : > { %s2876_s16 = smov (%p40_p7, %s38_s16), 0  ;;  %p238_p13 = scmp.eq.s32.totalorder %s2430_s29, 1 }
  0x18   : > { %2860 = sst [smem:[#allocation17_spill]] %s2876_s16  ;;  %p2457_p11 = por %p89_p9, %p88_p8 }
  0x19   : > { %p2463_p12 = por %p95_p1, %p94_p10  ;;  %s76_s20 = ssub.s32 %s2340_s27, %s2876_s16 }
  0x1a   : > { %p79_p0 = scmp.eq.s32.totalorder %s76_s20, 0  ;;  %p244_p2 = scmp.eq.s32.totalorder %s1991_s15, 1 }
  0x1b   : > { %p2470_p4 = por %p238_p13, %p88_p8  ;;  %p2097_p5 = scmp.lt.s32.totalorder %s2344_s28, 2 }
  0x1c   : > { %s2476_s22 = scalar_select %p79_p0, %s2332_s25, %s81_s17  }
  0x1d   : > { %p2478_p7 = por %p244_p2, %p94_p10  ;;  %s303_s30 = sand.u32 1, %s2332_s25  }
  0x1e   : > { %2864 = sst [smem:[#allocation18_spill]] %s2476_s22  ;;  %s1995_s8 = sshll.u32 %s303_s30, 2 }
  0x1f   : > { %s2865_s0 = scalar_select %p2478_p7, 1, 0 }
  0x20   : > { %s1996_s9 = sshll.u32 %s2340_s27, 2  ;;  %s307_s14 = scalar_lea.vmem [#allocation3], %s1995_s8 }
  0x21   : > { %2866 = sst [smem:[#allocation19_spill]] %s2865_s0  ;;  %s312_s13 = scalar_lea.hbm %s2842_s1, %s1996_s9 }
  0x22   : > { %s316_s15 = sshll.u32 %s307_s14, 4  ;;  %s314_s20 = sshll.u32 %s312_s13, 4  ;;  %s317_s15 = int_to_ptr.vmem [resolvable:$true] %s316_s15  ;;  %s315_s20 = int_to_ptr.hbm [resolvable:$true] %s314_s20 }
  0x23   : > { %p2086_p8 = pnand %p2097_p5, %p2457_p11  ;;  %s335_s16 = scalar_lea.hbm %s2843_s2, %s1996_s9 }
  0x24   : > { %s323_s22 = sand.u32 1, %s2344_s28   ;;  %s304_s0 = scalar_lea.sflag [#allocation4], %s303_s30 }
  0x25   : > { %2088 = dma.hbm_to_vmem [thread:$0]  (!%p2086_p8), %s315_s20, 64, %s317_s15, %s304_s0  }
  0x26   : > { %s337_s25 = sshll.u32 %s335_s16, 4  ;;  %s327_s27 = scalar_lea.vmem [#allocation6], %s1995_s8  ;;  %s338_s25 = int_to_ptr.hbm [resolvable:$true] %s337_s25 }
  0x27   : > { %s339_s23 = sshll.u32 %s327_s27, 4  ;;  %s324_s11 = scalar_lea.sflag [#allocation7], %s323_s22  ;;  %s340_s23 = int_to_ptr.vmem [resolvable:$true] %s339_s23 }
  0x28   : > { %2091 = dma.hbm_to_vmem [thread:$0]  (!%p2086_p8), %s338_s25, 64, %s340_s23, %s324_s11  }
  0x29   : > { %348 = sbr.rel (%p2438_p3) target bundleno = 1907 (0x773), region = 48  ;;  %s2496_s18 = sand.u32 (!%p2438_p3), 1, %s2328_s24  }
  0x2a   : > { %s2000_s5 = sshll.u32 (!%p2438_p3), %s2496_s18, 2  ;;  %s351_s9 = scalar_lea.sflag (!%p2438_p3), [#allocation4], %s2496_s18 }
  0x2b   : > { %s354_s30 = scalar_lea.vmem (!%p2438_p3), [#allocation3], %s2000_s5 }
  0x2e   : > { %2307 = dma.done.wait (%p2463_p12), %s351_s9, 64  }
  0x2f   : > { %2309 = vsyncadd (%p2463_p12), %s351_s9, 4294967232  ;;  %s360_s23 = sand.u32 1, %s2430_s29  }
  0x30   : > { %s361_s25 = scalar_lea.sflag [#allocation7], %s360_s23 }
  0x31   : > { %2311 = dma.done.wait (%p2463_p12), %s361_s25, 64  }
  0x32   : > { %2313 = vsyncadd (%p2463_p12), %s361_s25, 4294967232 }
  0x33   : > { %2315 = dma.done.wait (%p95_p1), [#allocation7], 288  }
  0x34   : > { %2317 = vsyncadd (%p95_p1), [#allocation7], 4294967008  ;;  %p433_p3 = scmp.eq.s32.totalorder %s2336_s26, 0  ;;  %s2514_s27 = scalar_lea.vmem [#allocation9], %s2000_s5 }
  0x35   : > { %v2349_v0 = vmov (%p433_p3), 0  }
  0x36   : > { %438 = sbr.rel (!%p433_p3) target bundleno = 59 (0x3b), region = 64  ;;  %439 = vst [vmem:[#allocation2] sm:$0x3] (%p433_p3), %v2349_v0 }
  0x37   : > { %440 = vst [vmem:[#allocation2 + $0x8] sm:$0x3] (%p433_p3), %v2349_v0 }
  0x3b PF: > { %v2516_v1 = vld [vmem:[%s354_s30] sm:$0xf]  ;;  %v446_v2 = vlaneseq  ;;  %v2350_v8 = vmov 0.0|0.0   ;;  %vm492_vm2 = vcmask 1045508   ;;  %v2351_v12 = vmov 0.0   ;;  %s2353_s29 = smov 1  }
  0x3c   : > { %v467_v4 = vmul.f32 0.1, %v2516_v1  ;;  %vm464_vm0 = vcmp.ge.f32.partialorder %v2516_v1, 0.0  ;;  %v486_v9 = vrot.slane %v2350_v8, 4  ;;  %v487_v10 = vrot.slane %v2350_v8, 6  ;;  %s2354_s19 = smov 127  }
  0x3d   : > { %v447_v3 = vand.u32 127, %v446_v2  ;;  %vm488_vm3 = vcmask 1041408   ;;  %vm496_vm4 = vcmask 1043456   ;;  %v2352_v23 = vmov 0   ;;  %v711_v29 = vld [vmem:[%s2845_s4] sm:$0xf] }
  0x3e   : > { %v470_v7 = vsel %vm464_vm0, %v2516_v1, %v467_v4  ;;  %v2527_v15 = vsel %vm492_vm2, %v486_v9, %v487_v10  ;;  %2161 = vset.pattern.permute.xlu2 %v2352_v23  ;;  %2162 = vset.pattern.permute.xlu1 %v2352_v23  ;;  %v2006_v35 = vld [vmem:[%s2844_s3 + $0x2] sm:$0x3]  ;;  %vm510_vm5 = vcmask 31744   ;;  %vm577_vm6 = vcmask 7168   ;;  %v501_v49 = vld [vmem:[%s2844_s3] sm:$0x3] }
  0x3f   : > { %v448_v5 = vadd.s32 128, %v447_v3  ;;  %2163 = vset.pattern.permute.xlu0 %v2352_v23  ;;  %vm653_vm7 = vcmask 1039360   ;;  %v2013_v51 = vld [vmem:[%s2844_s3 + $0x4] sm:$0x3]  ;;  %s2355_s17 = smov 3   ;;  %s2356_s9 = smov 125  }
  0x40   : > { %vm1073_vm10 = vcmask 23552   ;;  %vm1149_vm11 = vcmask 1022976   ;;  %s2357_s0 = smov 5   ;;  %s2358_s8 = smov 123   ;;  %vm1572_vm14 = vcmask 39936   ;;  %vm1648_vm15 = vcmask 1006592  }
  0x41   : > { %v2520_v6 = vadd.s32 4294967168, %v448_v5  ;;  %s2067_s23 = sshll.u32 %s2336_s26, 2  ;;  %s1859_s16 = sshll.u32 %s2514_s27, 4  ;;  %s1860_s16 = int_to_ptr.vmem [resolvable:$true] %s1859_s16 }
  0x42   : > { %s1857_s10 = scalar_lea.hbm %s2848_s7, %s2067_s23  ;;  %s1846_s26 = scalar_lea.sflag [#allocation5], %s2496_s18 }
  0x43   : > { %vm458_vm1 = vcmp.lt.s32.totalorder %v2520_v6, 16  ;;  %s2274_s13 = scalar_lea.hbm %s2848_s7, 8 }
  0x44   : > { %v479_v11 = vsel %vm458_vm1, %v470_v7, 0.0 }
  0x45   : > { %v481_v13 = vpack.c.bf16 %v479_v11, %v2351_v12 }
  0x47   : > { %v485_v14 = vrot.slane %v481_v13, 2 }
  0x49   : > { %v491_v16 = vsel %vm488_vm3, %v481_v13, %v485_v14 }
  0x4a   : > { %v497_v17 = vsel %vm496_vm4, %v491_v16, %v2527_v15 }
  0x4b   : > { %499 = vst [vmem:[#allocation2 + $0x2] sm:$0x3f] %v497_v17 }
  0x52   : > { %v502_v18 = vld [vmem:[#allocation2 + $0x2] sm:$0x3f] }
  0x53   : > { %506 = vst [vmem:[#allocation1] ss:$4 sm:$0xff] %v502_v18  ;;  %v500_v19 = vld [vmem:[#allocation2] sm:$0xff] }
  0x54   : > { %v632_v24 = vld [vmem:[#allocation2 + $0x2] sm:$0xff] }
  0x5a   : > { %v507_v20 = vld.sshfl [vmem:[#allocation1] sm:$0xff pattern:$0x73625140]  ;;  %v508_v21 = vld.sshfl [vmem:[#allocation1 + $0x8] sm:$0xff pattern:$0x73625140] }
  0x5b   : > { %v509_v22 = vld.sshfl [vmem:[#allocation1 + $0x10] sm:$0xff pattern:$0x73625140]  ;;  %v514_v34 = vsel %vm488_vm3, %v507_v20, 0  ;;  %v516_v38 = vsel %vm488_vm3, %v508_v21, 0 }
  0x5c   : > { %560 = vst [vmem:[#allocation1] ss:$4 sm:$0xff] %v500_v19  ;;  %527 = vmatpush.bf16.msra.mxu0 %v514_v34  ;;  %v518_v36 = vsel %vm488_vm3, %v509_v22, 0  ;;  %540 = vmatpush.bf16.msra.mxu1 %v516_v38 }
  0x5d   : > { %553 = vmatpush.bf16.msra.mxu2 %v518_v36 }
  0x5f   : > { %2007 = vmatmul.msk.bf16.vlgmr.msra.gmra.mxu0 %vm510_vm5, %v2006_v35  ;;  %2008 = vmatmul.msk.bf16.vlgmr.msra.gmra.mxu1 %vm510_vm5, %v2006_v35 }
  0x60   : > { %2009 = vmatmul.msk.bf16.vlgmr.msra.gmra.mxu2 %vm510_vm5, %v2006_v35 }
  0x63   : > { %v561_v25 = vld.sshfl [vmem:[#allocation1] sm:$0xff pattern:$0x73625140]  ;;  %v565_v26 = vld.sshfl [vmem:[#allocation1 + $0x10] sm:$0xff pattern:$0x73625140] }
  0x64   : > { %v567_v27 = vld.sshfl [vmem:[#allocation1 + $0x18] sm:$0xff pattern:$0x73625140]  ;;  %569 = vrot.lane.b32.xlu0 %v561_v25, %s2353_s29  ;;  %v563_v28 = vld.sshfl [vmem:[#allocation1 + $0x8] sm:$0xff pattern:$0x73625140]  ;;  %573 = vrot.lane.b32.xlu2 %v565_v26, %s2353_s29 }
  0x65   : > { %636 = vst [vmem:[#allocation1] ss:$4 sm:$0xff] %v632_v24 }
  0x6c   : > { %571 = vrot.lane.b32.xlu0 %v563_v28, %s2353_s29  ;;  %v639_v30 = vld.sshfl [vmem:[#allocation1 + $0x8] sm:$0xff pattern:$0x73625140]  ;;  %714 = vperm.xlu2 %2161, %v711_v29   ;;  %v637_v31 = vld.sshfl [vmem:[#allocation1] sm:$0xff pattern:$0x73625140] }
  0x6d   : > { %647 = vrot.lane.b32.xlu1 %v639_v30, %s2354_s19  ;;  %v641_v32 = vld.sshfl [vmem:[#allocation1 + $0x10] sm:$0xff pattern:$0x73625140]  ;;  %v643_v33 = vld.sshfl [vmem:[#allocation1 + $0x18] sm:$0xff pattern:$0x73625140] }
  0x74   : > { %575 = vrot.lane.b32.xlu0 %v567_v27, %s2353_s29  ;;  %645 = vrot.lane.b32.xlu2 %v637_v31, %s2354_s19 }
  0x75   : > { %649 = vrot.lane.b32.xlu1 %v641_v32, %s2354_s19 }
  0x7d   : > { %651 = vrot.lane.b32.xlu1 %v643_v33, %s2354_s19 }
  0xbe   : > { %v574_v37 = vpop.permute.xlu2 %573 }
  0xc6   : > { %v715_v39 = vpop.permute.xlu2 %714 }
  0xce   : > { %v646_v41 = vpop.permute.xlu2 %645 }
  0xd6   : > { %v570_v40 = vpop.permute.xlu0 %569 }
  0xdc   : > { %v529_v61 = vpop.f32.mrf.mxu0  ;;  %v542_v63 = vpop.f32.mrf.mxu1 }
  0xde   : > { %v572_v42 = vpop.permute.xlu0 %571 }
  0xdf   : > { %v648_v43 = vpop.permute.xlu1 %647  ;;  %v578_v44 = vsel %vm577_vm6, %v570_v40, %v572_v42  ;;  %v579_v45 = vsel %vm577_vm6, %v572_v42, %v574_v37  ;;  %v956_v42 = vld [vmem:[%s2847_s6] sm:$0xf] }
  0xe0   : > { %v585_v46 = vsel %vm488_vm3, %v578_v44, 0  ;;  %v588_v47 = vsel %vm488_vm3, %v579_v45, 0  ;;  %v654_v48 = vsel %vm653_vm7, %v646_v41, %v648_v43 }
  0xe1   : > { %600 = vmatpush.bf16.msra.mxu3 %v585_v46  ;;  %613 = vmatpush.bf16.msrb.mxu0 %v588_v47  ;;  %v661_v50 = vsel %vm488_vm3, %v654_v48, 0  ;;  %v752_v47 = vld [vmem:[#allocation8 + $0x2] sm:$0x3] }
  0xe2   : > { %676 = vmatpush.bf16.msrb.mxu2 %v661_v50 }
  0xe3   : > { %v555_v0 = vpop.f32.mrf.mxu2 }
  0xe4   : > { %2010 = vmatmul.msk.bf16.vlgmr.msra.gmra.mxu3 %vm510_vm5, %v501_v49  ;;  %2011 = vmatmul.msk.bf16.vlgmr.msrb.gmra.mxu0 %vm510_vm5, %v501_v49  ;;  %v531_v62 = vpop.f32.mrf.mxu0  ;;  %v544_v2 = vpop.f32.mrf.mxu1  ;;  %v880_v0 = vld [vmem:[#allocation8 + $0x4] sm:$0x3] }
  0xe5   : > { %2014 = vmatmul.msk.bf16.vlgmr.msrb.gmra.mxu2 %vm510_vm5, %v2013_v51 }
  0xe6   : > { %v576_v52 = vpop.permute.xlu0 %575 }
  0xe7   : > { %v650_v53 = vpop.permute.xlu1 %649  ;;  %v580_v54 = vsel %vm577_vm6, %v574_v37, %v576_v52 }
  0xe8   : > { %v655_v55 = vsel %vm653_vm7, %v648_v43, %v650_v53  ;;  %v591_v56 = vsel %vm488_vm3, %v580_v54, 0 }
  0xe9   : > { %v664_v57 = vsel %vm488_vm3, %v655_v55, 0  ;;  %626 = vmatpush.bf16.msrb.mxu1 %v591_v56  ;;  %v749_v56 = vld [vmem:[#allocation8] sm:$0x3] }
  0xea   : > { %689 = vmatpush.bf16.msrb.mxu3 %v664_v57 }
  0xeb   : > { %v557_v3 = vpop.f32.mrf.mxu2 }
  0xec   : > { %2012 = vmatmul.msk.bf16.vlgmr.msrb.gmra.mxu1 %vm510_vm5, %v501_v49 }
  0xef   : > { %v652_v58 = vpop.permute.xlu1 %651 }
  0xf0   : > { %v656_v59 = vsel %vm653_vm7, %v650_v53, %v652_v58 }
  0xf1   : > { %v667_v60 = vsel %vm488_vm3, %v656_v59, 0 }
  0xf2   : > { %702 = vmatpush.bf16.msra.mxu0 %v667_v60 }
  0xf4   : > { %2015 = vmatmul.msk.bf16.vlgmr.msrb.gmra.mxu3 %vm510_vm5, %v2013_v51 }
  0xf5   : > { %2016 = vmatmul.msk.bf16.vlgmr.msra.gmra.mxu0 %vm510_vm5, %v2013_v51 }
 0x161   : > { %v615_v4 = vpop.f32.mrf.mxu0 }
 0x162   : > { %v616_v16 = vadd.f32 %v615_v4, %v542_v63 }
 0x167   : > { %v602_v5 = vpop.f32.mrf.mxu3 }
 0x168   : > { %v678_v7 = vpop.f32.mrf.mxu2 }
 0x169   : > { %v617_v8 = vpop.f32.mrf.mxu0  ;;  %v628_v9 = vpop.f32.mrf.mxu1 }
 0x16f   : > { %v604_v10 = vpop.f32.mrf.mxu3 }
 0x170   : > { %v680_v11 = vpop.f32.mrf.mxu2 }
 0x171   : > { %v630_v13 = vpop.f32.mrf.mxu1 }
 0x172   : > { %v704_v14 = vpop.f32.mrf.mxu0 }
 0x177   : > { %v691_v17 = vpop.f32.mrf.mxu3 }
 0x178   : > { %v709_v18 = vadd.f32 %v691_v17, %v616_v16 }
 0x17a   : > { %v718_v19 = vadd.f32 %v715_v39, %v709_v18  ;;  %v706_v20 = vpop.f32.mrf.mxu0 }
 0x17c   : > { %vm721_vm8 = vcmp.ge.f32.partialorder %v718_v19, 0.0  ;;  %v724_v21 = vmul.f32 0.1, %v718_v19 }
 0x17e   : > { %v727_v22 = vsel %vm721_vm8, %v718_v19, %v724_v21 }
 0x17f   : > { %v730_v23 = vsel %vm458_vm1, %v727_v22, 0.0  ;;  %v693_v24 = vpop.f32.mrf.mxu3 }
 0x180   : > { %v732_v25 = vpack.c.bf16 %v730_v23, %v2351_v12 }
 0x182   : > { %v736_v26 = vrot.slane %v732_v25, 2 }
 0x184   : > { %v741_v27 = vsel %vm488_vm3, %v732_v25, %v736_v26 }
 0x185   : > { %v745_v28 = vsel %vm496_vm4, %v741_v27, %v2527_v15 }
 0x186   : > { %747 = vst [vmem:[#allocation2 + $0x2] sm:$0x3f] %v745_v28 }
 0x18d   : > { %v750_v29 = vld [vmem:[#allocation2 + $0x2] sm:$0x3f] }
 0x18e   : > { %754 = vst [vmem:[#allocation1] ss:$4 sm:$0xff] %v750_v29  ;;  %v748_v32 = vld [vmem:[#allocation2] sm:$0xff] }
 0x18f   : > { %v878_v37 = vld [vmem:[#allocation2 + $0x2] sm:$0xff] }
 0x195   : > { %v755_v30 = vld.sshfl [vmem:[#allocation1] sm:$0xff pattern:$0x73625140]  ;;  %v756_v31 = vld.sshfl [vmem:[#allocation1 + $0x8] sm:$0xff pattern:$0x73625140] }
 0x196   : > { %v761_v33 = vsel %vm488_vm3, %v755_v30, 0  ;;  %v763_v34 = vsel %vm488_vm3, %v756_v31, 0  ;;  %v757_v35 = vld.sshfl [vmem:[#allocation1 + $0x10] sm:$0xff pattern:$0x73625140] }
 0x197   : > { %774 = vmatpush.bf16.msra.mxu1 %v761_v33  ;;  %787 = vmatpush.bf16.msra.mxu2 %v763_v34  ;;  %v765_v36 = vsel %vm488_vm3, %v757_v35, 0  ;;  %807 = vst [vmem:[#allocation1] ss:$4 sm:$0xff] %v748_v32 }
 0x198   : > { %800 = vmatpush.bf16.msra.mxu3 %v765_v36 }
 0x19a   : > { %2017 = vmatmul.msk.bf16.vlgmr.msra.gmra.mxu1 %vm510_vm5, %v752_v47  ;;  %2018 = vmatmul.msk.bf16.vlgmr.msra.gmra.mxu2 %vm510_vm5, %v752_v47 }
 0x19b   : > { %2019 = vmatmul.msk.bf16.vlgmr.msra.gmra.mxu3 %vm510_vm5, %v752_v47 }
 0x19e   : > { %v812_v38 = vld.sshfl [vmem:[#allocation1 + $0x10] sm:$0xff pattern:$0x73625140]  ;;  %v814_v39 = vld.sshfl [vmem:[#allocation1 + $0x18] sm:$0xff pattern:$0x73625140] }
 0x19f   : > { %820 = vrot.lane.b32.xlu2 %v812_v38, %s2353_s29  ;;  %v810_v40 = vld.sshfl [vmem:[#allocation1 + $0x8] sm:$0xff pattern:$0x73625140]  ;;  %v808_v41 = vld.sshfl [vmem:[#allocation1] sm:$0xff pattern:$0x73625140] }
 0x1a0   : > { %818 = vrot.lane.b32.xlu1 %v810_v40, %s2353_s29  ;;  %816 = vrot.lane.b32.xlu0 %v808_v41, %s2353_s29  ;;  %882 = vst [vmem:[#allocation1] ss:$4 sm:$0xff] %v878_v37 }
 0x1a7   : > { %959 = vperm.xlu2 %2161, %v956_v42   ;;  %v887_v43 = vld.sshfl [vmem:[#allocation1 + $0x10] sm:$0xff pattern:$0x73625140]  ;;  %v885_v44 = vld.sshfl [vmem:[#allocation1 + $0x8] sm:$0xff pattern:$0x73625140] }
 0x1a8   : > { %895 = vrot.lane.b32.xlu1 %v887_v43, %s2354_s19  ;;  %893 = vrot.lane.b32.xlu0 %v885_v44, %s2354_s19  ;;  %v883_v45 = vld.sshfl [vmem:[#allocation1] sm:$0xff pattern:$0x73625140]  ;;  %v889_v46 = vld.sshfl [vmem:[#allocation1 + $0x18] sm:$0xff pattern:$0x73625140] }
 0x1af   : > { %891 = vrot.lane.b32.xlu2 %v883_v45, %s2354_s19 }
 0x1b0   : > { %897 = vrot.lane.b32.xlu1 %v889_v46, %s2354_s19  ;;  %822 = vrot.lane.b32.xlu0 %v814_v39, %s2353_s29  ;;  %s1861_s19 = sshll.u32 %s1857_s10, 4  ;;  %s1862_s19 = int_to_ptr.hbm [resolvable:$true] %s1861_s19 }
 0x1b1   : > { %s2268_s22 = sshra.s32 %s1862_s19, 4  ;;  %s2269_s22 = int_to_ptr.hbm [resolvable:$true] %s2268_s22 }
 0x1b2   : > { %p2275_p11 = scmp.lt.s32.totalorder %s2269_s22, %s2848_s7 }
 0x1f9   : > { %v821_v48 = vpop.permute.xlu2 %820 }
 0x201   : > { %v960_v49 = vpop.permute.xlu2 %959 }
 0x209   : > { %v892_v57 = vpop.permute.xlu2 %891 }
 0x212   : > { %v819_v50 = vpop.permute.xlu1 %818  ;;  %v817_v51 = vpop.permute.xlu0 %816 }
 0x213   : > { %v825_v52 = vsel %vm577_vm6, %v819_v50, %v821_v48  ;;  %v824_v53 = vsel %vm577_vm6, %v817_v51, %v819_v50 }
 0x214   : > { %v834_v54 = vsel %vm488_vm3, %v825_v52, 0  ;;  %v831_v55 = vsel %vm488_vm3, %v824_v53, 0  ;;  %v2038_v52 = vld [vmem:[%s2845_s4 + $0x4] sm:$0xf] }
 0x215   : > { %846 = vmatpush.bf16.msrb.mxu0 %v831_v55  ;;  %859 = vmatpush.bf16.msrb.mxu1 %v834_v54 }
 0x217   : > { %v776_v9 = vpop.f32.mrf.mxu1 }
 0x218   : > { %2020 = vmatmul.msk.bf16.vlgmr.msrb.gmra.mxu0 %vm510_vm5, %v749_v56  ;;  %2021 = vmatmul.msk.bf16.vlgmr.msrb.gmra.mxu1 %vm510_vm5, %v749_v56 }
 0x21a   : > { %v896_v58 = vpop.permute.xlu1 %895  ;;  %v894_v59 = vpop.permute.xlu0 %893 }
 0x21b   : > { %v899_v60 = vsel %vm653_vm7, %v892_v57, %v894_v59  ;;  %v900_v61 = vsel %vm653_vm7, %v894_v59, %v896_v58  ;;  %v2027_v57 = vld [vmem:[%s2844_s3 + $0x8] sm:$0x3] }
 0x21c   : > { %v906_v62 = vsel %vm488_vm3, %v899_v60, 0  ;;  %v909_v63 = vsel %vm488_vm3, %v900_v61, 0 }
 0x21d   : > { %921 = vmatpush.bf16.msrb.mxu3 %v906_v62  ;;  %934 = vmatpush.bf16.msra.mxu0 %v909_v63  ;;  %v789_v13 = vpop.f32.mrf.mxu2 }
 0x21e   : > { %v802_v10 = vpop.f32.mrf.mxu3 }
 0x21f   : > { %v778_v11 = vpop.f32.mrf.mxu1 }
 0x220   : > { %2023 = vmatmul.msk.bf16.vlgmr.msrb.gmra.mxu3 %vm510_vm5, %v880_v0 }
 0x222   : > { %v898_v2 = vpop.permute.xlu1 %897  ;;  %v823_v3 = vpop.permute.xlu0 %822 }
 0x223   : > { %v901_v4 = vsel %vm653_vm7, %v896_v58, %v898_v2  ;;  %v826_v5 = vsel %vm577_vm6, %v821_v48, %v823_v3  ;;  %v2026_v2 = vld [vmem:[%s2844_s3 + $0x6] sm:$0x3] }
 0x224   : > { %v912_v7 = vsel %vm488_vm3, %v901_v4, 0  ;;  %v837_v8 = vsel %vm488_vm3, %v826_v5, 0 }
 0x225   : > { %872 = vmatpush.bf16.msrb.mxu2 %v837_v8  ;;  %947 = vmatpush.bf16.msra.mxu1 %v912_v7  ;;  %v791_v16 = vpop.f32.mrf.mxu2 }
 0x226   : > { %v804_v14 = vpop.f32.mrf.mxu3  ;;  %v2034_v16 = vld [vmem:[%s2844_s3 + $0xa] sm:$0x3] }
 0x228   : > { %2024 = vmatmul.msk.bf16.vlgmr.msra.gmra.mxu0 %vm510_vm5, %v880_v0  ;;  %2022 = vmatmul.msk.bf16.vlgmr.msrb.gmra.mxu2 %vm510_vm5, %v749_v56 }
 0x229   : > { %2025 = vmatmul.msk.bf16.vlgmr.msra.gmra.mxu1 %vm510_vm5, %v880_v0 }
 0x295   : > { %v848_v17 = vpop.f32.mrf.mxu0  ;;  %v861_v18 = vpop.f32.mrf.mxu1 }
 0x296   : > { %v862_v21 = vadd.f32 %v861_v18, %v789_v13 }
 0x29d   : > { %v850_v19 = vpop.f32.mrf.mxu0  ;;  %v863_v20 = vpop.f32.mrf.mxu1 }
 0x2a3   : > { %v923_v22 = vpop.f32.mrf.mxu3 }
 0x2a5   : > { %v936_v23 = vpop.f32.mrf.mxu0 }
 0x2a6   : > { %v954_v24 = vadd.f32 %v936_v23, %v862_v21  ;;  %v949_v25 = vpop.f32.mrf.mxu1 }
 0x2a8   : > { %v963_v26 = vadd.f32 %v960_v49, %v954_v24 }
 0x2aa   : > { %v2618_v27 = vadd.f32 %v963_v26, %v2516_v1 }
 0x2ab   : > { %v874_v28 = vpop.f32.mrf.mxu2  ;;  %v925_v29 = vpop.f32.mrf.mxu3 }
 0x2ac   : > { %vm969_vm9 = vcmp.ge.f32.partialorder %v2618_v27, 0.0  ;;  %v972_v30 = vmul.f32 0.1, %v2618_v27 }
 0x2ad   : > { %v938_v31 = vpop.f32.mrf.mxu0 }
 0x2ae   : > { %v975_v32 = vsel %vm969_vm9, %v2618_v27, %v972_v30  ;;  %v951_v33 = vpop.f32.mrf.mxu1 }
 0x2af   : > { %v978_v34 = vsel %vm458_vm1, %v975_v32, 0.0 }
 0x2b0   : > { %v980_v35 = vpack.c.bf16 %v978_v34, %v2351_v12 }
 0x2b2   : > { %v984_v36 = vrot.slane %v980_v35, 2 }
 0x2b3   : > { %v876_v37 = vpop.f32.mrf.mxu2 }
 0x2b4   : > { %v989_v1 = vsel %vm488_vm3, %v980_v35, %v984_v36 }
 0x2b5   : > { %v993_v38 = vsel %vm496_vm4, %v989_v1, %v2527_v15 }
 0x2b6   : > { %995 = vst [vmem:[#allocation2 + $0x2] sm:$0x3f] %v993_v38 }
 0x2bd   : > { %v999_v39 = vld [vmem:[#allocation2 + $0x2] sm:$0x3f] }
 0x2be   : > { %1003 = vst [vmem:[#allocation1] ss:$4 sm:$0xff] %v999_v39  ;;  %v996_v42 = vld [vmem:[#allocation2] sm:$0xff] }
 0x2bf   : > { %v1128_v47 = vld [vmem:[#allocation2 + $0x2] sm:$0xff] }
 0x2c5   : > { %v1004_v40 = vld.sshfl [vmem:[#allocation1] sm:$0xff pattern:$0x73625140]  ;;  %v1005_v41 = vld.sshfl [vmem:[#allocation1 + $0x8] sm:$0xff pattern:$0x73625140] }
 0x2c6   : > { %v1010_v43 = vsel %vm488_vm3, %v1004_v40, 0  ;;  %v1012_v44 = vsel %vm488_vm3, %v1005_v41, 0  ;;  %v1006_v45 = vld.sshfl [vmem:[#allocation1 + $0x10] sm:$0xff pattern:$0x73625140] }
 0x2c7   : > { %1023 = vmatpush.bf16.msra.mxu2 %v1010_v43  ;;  %1036 = vmatpush.bf16.msra.mxu3 %v1012_v44  ;;  %v1014_v46 = vsel %vm488_vm3, %v1006_v45, 0  ;;  %1056 = vst [vmem:[#allocation1] ss:$4 sm:$0xff] %v996_v42 }
 0x2c8   : > { %1049 = vmatpush.bf16.msrb.mxu0 %v1014_v46 }
 0x2ca   : > { %2028 = vmatmul.msk.bf16.vlgmr.msra.gmra.mxu2 %vm510_vm5, %v2027_v57  ;;  %2029 = vmatmul.msk.bf16.vlgmr.msra.gmra.mxu3 %vm510_vm5, %v2027_v57 }
 0x2cb   : > { %2030 = vmatmul.msk.bf16.vlgmr.msrb.gmra.mxu0 %vm510_vm5, %v2027_v57 }
 0x2ce   : > { %v1063_v48 = vld.sshfl [vmem:[#allocation1 + $0x18] sm:$0xff pattern:$0x73625140]  ;;  %v1061_v49 = vld.sshfl [vmem:[#allocation1 + $0x10] sm:$0xff pattern:$0x73625140] }
 0x2cf   : > { %1069 = vrot.lane.b32.xlu2 %v1061_v49, %s2355_s17  ;;  %v1059_v50 = vld.sshfl [vmem:[#allocation1 + $0x8] sm:$0xff pattern:$0x73625140]  ;;  %v1057_v51 = vld.sshfl [vmem:[#allocation1] sm:$0xff pattern:$0x73625140] }
 0x2d0   : > { %1067 = vrot.lane.b32.xlu1 %v1059_v50, %s2355_s17  ;;  %1065 = vrot.lane.b32.xlu0 %v1057_v51, %s2355_s17  ;;  %1132 = vst [vmem:[#allocation1] ss:$4 sm:$0xff] %v1128_v47 }
 0x2d7   : > { %1211 = vperm.xlu2 %2161, %v2038_v52   ;;  %v1137_v53 = vld.sshfl [vmem:[#allocation1 + $0x10] sm:$0xff pattern:$0x73625140]  ;;  %v1135_v54 = vld.sshfl [vmem:[#allocation1 + $0x8] sm:$0xff pattern:$0x73625140] }
 0x2d8   : > { %1145 = vrot.lane.b32.xlu1 %v1137_v53, %s2356_s9  ;;  %1143 = vrot.lane.b32.xlu0 %v1135_v54, %s2356_s9  ;;  %v1139_v55 = vld.sshfl [vmem:[#allocation1 + $0x18] sm:$0xff pattern:$0x73625140]  ;;  %v1133_v56 = vld.sshfl [vmem:[#allocation1] sm:$0xff pattern:$0x73625140] }
 0x2e0   : > { %1147 = vrot.lane.b32.xlu1 %v1139_v55, %s2356_s9  ;;  %1071 = vrot.lane.b32.xlu0 %v1063_v48, %s2355_s17 }
 0x2e8   : > { %1141 = vrot.lane.b32.xlu1 %v1133_v56, %s2356_s9 }
 0x329   : > { %v1070_v58 = vpop.permute.xlu2 %1069 }
 0x331   : > { %v1212_v34 = vpop.permute.xlu2 %1211 }
 0x342   : > { %v1068_v59 = vpop.permute.xlu1 %1067  ;;  %v1066_v60 = vpop.permute.xlu0 %1065 }
 0x343   : > { %v1075_v61 = vsel %vm1073_vm10, %v1068_v59, %v1070_v58  ;;  %v1074_v62 = vsel %vm1073_vm10, %v1066_v60, %v1068_v59 }
 0x344   : > { %v1084_v63 = vsel %vm488_vm3, %v1075_v61, 0  ;;  %v1081_v0 = vsel %vm488_vm3, %v1074_v62, 0 }
 0x345   : > { %1096 = vmatpush.bf16.msrb.mxu1 %v1081_v0  ;;  %1109 = vmatpush.bf16.msrb.mxu2 %v1084_v63  ;;  %v2048_v0 = vld [vmem:[%s2847_s6 + $0x4] sm:$0xf] }
 0x348   : > { %2031 = vmatmul.msk.bf16.vlgmr.msrb.gmra.mxu1 %vm510_vm5, %v2026_v2  ;;  %2032 = vmatmul.msk.bf16.vlgmr.msrb.gmra.mxu2 %vm510_vm5, %v2026_v2  ;;  %v1051_v20 = vpop.f32.mrf.mxu0 }
 0x34a   : > { %v1146_v3 = vpop.permute.xlu1 %1145  ;;  %v1144_v4 = vpop.permute.xlu0 %1143 }
 0x34b   : > { %v1151_v5 = vsel %vm1149_vm11, %v1144_v4, %v1146_v3 }
 0x34c   : > { %v1160_v7 = vsel %vm488_vm3, %v1151_v5, 0 }
 0x34d   : > { %1185 = vmatpush.bf16.msra.mxu1 %v1160_v7  ;;  %v1025_v21 = vpop.f32.mrf.mxu2  ;;  %v1038_v24 = vpop.f32.mrf.mxu3 }
 0x350   : > { %v1053_v22 = vpop.f32.mrf.mxu0 }
 0x352   : > { %v1148_v8 = vpop.permute.xlu1 %1147  ;;  %v1072_v9 = vpop.permute.xlu0 %1071 }
 0x353   : > { %v1152_v10 = vsel %vm1149_vm11, %v1146_v3, %v1148_v8  ;;  %v1076_v11 = vsel %vm1073_vm10, %v1070_v58, %v1072_v9 }
 0x354   : > { %v1163_v13 = vsel %vm488_vm3, %v1152_v10, 0  ;;  %v1087_v14 = vsel %vm488_vm3, %v1076_v11, 0 }
 0x355   : > { %1122 = vmatpush.bf16.msrb.mxu3 %v1087_v14  ;;  %1198 = vmatpush.bf16.msra.mxu2 %v1163_v13  ;;  %v1027_v23 = vpop.f32.mrf.mxu2  ;;  %v1040_v25 = vpop.f32.mrf.mxu3  ;;  %v1247_v14 = vld [vmem:[#allocation8 + $0x6] sm:$0x3] }
 0x356   : > { %v1378_v25 = vld [vmem:[#allocation8 + $0xa] sm:$0x3] }
 0x358   : > { %2036 = vmatmul.msk.bf16.vlgmr.msra.gmra.mxu1 %vm510_vm5, %v2034_v16  ;;  %2033 = vmatmul.msk.bf16.vlgmr.msrb.gmra.mxu3 %vm510_vm5, %v2026_v2 }
 0x359   : > { %2037 = vmatmul.msk.bf16.vlgmr.msra.gmra.mxu2 %vm510_vm5, %v2034_v16 }
 0x35a   : > { %v1142_v17 = vpop.permute.xlu1 %1141 }
 0x35b   : > { %v1150_v18 = vsel %vm1149_vm11, %v1142_v17, %v1144_v4  ;;  %v1250_v4 = vld [vmem:[#allocation8 + $0x8] sm:$0x3] }
 0x35c   : > { %v1157_v19 = vsel %vm488_vm3, %v1150_v18, 0 }
 0x35d   : > { %1172 = vmatpush.bf16.msra.mxu0 %v1157_v19 }
 0x360   : > { %2035 = vmatmul.msk.bf16.vlgmr.msra.gmra.mxu0 %vm510_vm5, %v2034_v16 }
 0x3c5   : > { %v1098_v26 = vpop.f32.mrf.mxu1 }
 0x3cb   : > { %v1111_v28 = vpop.f32.mrf.mxu2 }
 0x3cc   : > { %v1112_v30 = vadd.f32 %v1111_v28, %v1038_v24 }
 0x3cd   : > { %v1100_v29 = vpop.f32.mrf.mxu1 }
 0x3d3   : > { %v1113_v31 = vpop.f32.mrf.mxu2 }
 0x3d5   : > { %v1187_v32 = vpop.f32.mrf.mxu1 }
 0x3d6   : > { %v1205_v33 = vadd.f32 %v1187_v32, %v1112_v30 }
 0x3d8   : > { %v1215_v35 = vadd.f32 %v1212_v34, %v1205_v33 }
 0x3da   : > { %vm1218_vm12 = vcmp.ge.f32.partialorder %v1215_v35, 0.0  ;;  %v1221_v36 = vmul.f32 0.1, %v1215_v35 }
 0x3db   : > { %v1124_v37 = vpop.f32.mrf.mxu3 }
 0x3dc   : > { %v1224_v1 = vsel %vm1218_vm12, %v1215_v35, %v1221_v36  ;;  %v1200_v38 = vpop.f32.mrf.mxu2 }
 0x3dd   : > { %v1227_v39 = vsel %vm458_vm1, %v1224_v1, 0.0  ;;  %v1189_v40 = vpop.f32.mrf.mxu1  ;;  %v1174_v41 = vpop.f32.mrf.mxu0 }
 0x3de   : > { %v1229_v42 = vpack.c.bf16 %v1227_v39, %v2351_v12 }
 0x3e0   : > { %v1233_v43 = vrot.slane %v1229_v42, 2 }
 0x3e2   : > { %v1238_v44 = vsel %vm488_vm3, %v1229_v42, %v1233_v43 }
 0x3e3   : > { %v1242_v45 = vsel %vm496_vm4, %v1238_v44, %v2527_v15  ;;  %v1126_v46 = vpop.f32.mrf.mxu3 }
 0x3e4   : > { %1244 = vst [vmem:[#allocation2 + $0x2] sm:$0x3f] %v1242_v45  ;;  %v1202_v47 = vpop.f32.mrf.mxu2 }
 0x3e5   : > { %v1176_v48 = vpop.f32.mrf.mxu0 }
 0x3eb   : > { %v1248_v49 = vld [vmem:[#allocation2 + $0x2] sm:$0x3f] }
 0x3ec   : > { %1252 = vst [vmem:[#allocation1] ss:$4 sm:$0xff] %v1248_v49  ;;  %v1245_v52 = vld [vmem:[#allocation2] sm:$0xff] }
 0x3ed   : > { %v1376_v57 = vld [vmem:[#allocation2 + $0x2] sm:$0xff] }
 0x3f3   : > { %v1253_v50 = vld.sshfl [vmem:[#allocation1] sm:$0xff pattern:$0x73625140]  ;;  %v1254_v51 = vld.sshfl [vmem:[#allocation1 + $0x8] sm:$0xff pattern:$0x73625140] }
 0x3f4   : > { %v1255_v53 = vld.sshfl [vmem:[#allocation1 + $0x10] sm:$0xff pattern:$0x73625140]  ;;  %v1259_v54 = vsel %vm488_vm3, %v1253_v50, 0  ;;  %v1261_v55 = vsel %vm488_vm3, %v1254_v51, 0 }
 0x3f5   : > { %1305 = vst [vmem:[#allocation1] ss:$4 sm:$0xff] %v1245_v52  ;;  %1272 = vmatpush.bf16.msra.mxu3 %v1259_v54  ;;  %1285 = vmatpush.bf16.msrb.mxu0 %v1261_v55  ;;  %v1263_v56 = vsel %vm488_vm3, %v1255_v53, 0 }
 0x3f6   : > { %1298 = vmatpush.bf16.msrb.mxu1 %v1263_v56 }
 0x3f8   : > { %2039 = vmatmul.msk.bf16.vlgmr.msra.gmra.mxu3 %vm510_vm5, %v1250_v4  ;;  %2040 = vmatmul.msk.bf16.vlgmr.msrb.gmra.mxu0 %vm510_vm5, %v1250_v4 }
 0x3f9   : > { %2041 = vmatmul.msk.bf16.vlgmr.msrb.gmra.mxu1 %vm510_vm5, %v1250_v4 }
 0x3fc   : > { %v1312_v58 = vld.sshfl [vmem:[#allocation1 + $0x18] sm:$0xff pattern:$0x73625140]  ;;  %v1308_v59 = vld.sshfl [vmem:[#allocation1 + $0x8] sm:$0xff pattern:$0x73625140] }
 0x3fd   : > { %1316 = vrot.lane.b32.xlu0 %v1308_v59, %s2355_s17  ;;  %v1306_v60 = vld.sshfl [vmem:[#allocation1] sm:$0xff pattern:$0x73625140]  ;;  %v1310_v61 = vld.sshfl [vmem:[#allocation1 + $0x10] sm:$0xff pattern:$0x73625140] }
 0x3fe   : > { %1314 = vrot.lane.b32.xlu2 %v1306_v60, %s2355_s17  ;;  %1380 = vst [vmem:[#allocation1] ss:$4 sm:$0xff] %v1376_v57 }
 0x405   : > { %v1385_v62 = vld.sshfl [vmem:[#allocation1 + $0x10] sm:$0xff pattern:$0x73625140]  ;;  %v1383_v63 = vld.sshfl [vmem:[#allocation1 + $0x8] sm:$0xff pattern:$0x73625140] }
 0x406   : > { %1318 = vrot.lane.b32.xlu2 %v1310_v61, %s2355_s17  ;;  %1393 = vrot.lane.b32.xlu1 %v1385_v62, %s2356_s9  ;;  %v1387_v2 = vld.sshfl [vmem:[#allocation1 + $0x18] sm:$0xff pattern:$0x73625140]  ;;  %v1381_v3 = vld.sshfl [vmem:[#allocation1] sm:$0xff pattern:$0x73625140] }
 0x407   : > { %1391 = vrot.lane.b32.xlu0 %v1383_v63, %s2356_s9 }
 0x40e   : > { %1458 = vperm.xlu2 %2161, %v2048_v0   ;;  %1320 = vrot.lane.b32.xlu1 %v1312_v58, %s2355_s17 }
 0x40f   : > { %1395 = vrot.lane.b32.xlu0 %v1387_v2, %s2356_s9 }
 0x416   : > { %1389 = vrot.lane.b32.xlu1 %v1381_v3, %s2356_s9 }
 0x458   : > { %v1315_v5 = vpop.permute.xlu2 %1314 }
 0x460   : > { %v1319_v7 = vpop.permute.xlu2 %1318 }
 0x468   : > { %v1459_v44 = vpop.permute.xlu2 %1458 }
 0x46f   : > { %v1317_v8 = vpop.permute.xlu0 %1316 }
 0x470   : > { %v1322_v9 = vsel %vm1073_vm10, %v1315_v5, %v1317_v8  ;;  %v1323_v10 = vsel %vm1073_vm10, %v1317_v8, %v1319_v7 }
 0x471   : > { %v1329_v11 = vsel %vm488_vm3, %v1322_v9, 0  ;;  %v1332_v13 = vsel %vm488_vm3, %v1323_v10, 0 }
 0x472   : > { %1344 = vmatpush.bf16.msrb.mxu2 %v1329_v11  ;;  %1357 = vmatpush.bf16.msrb.mxu3 %v1332_v13  ;;  %v2061_v13 = vld [vmem:[%s2845_s4 + $0x8] sm:$0xf] }
 0x475   : > { %2042 = vmatmul.msk.bf16.vlgmr.msrb.gmra.mxu2 %vm510_vm5, %v1247_v14  ;;  %2043 = vmatmul.msk.bf16.vlgmr.msrb.gmra.mxu3 %vm510_vm5, %v1247_v14  ;;  %v1287_v35 = vpop.f32.mrf.mxu0 }
 0x476   : > { %v1300_v31 = vpop.f32.mrf.mxu1 }
 0x478   : > { %v1394_v16 = vpop.permute.xlu1 %1393 }
 0x479   : > { %v1392_v17 = vpop.permute.xlu0 %1391 }
 0x47a   : > { %v1398_v18 = vsel %vm1149_vm11, %v1392_v17, %v1394_v16 }
 0x47b   : > { %v1407_v19 = vsel %vm488_vm3, %v1398_v18, 0  ;;  %v1274_v32 = vpop.f32.mrf.mxu3 }
 0x47c   : > { %1432 = vmatpush.bf16.msra.mxu2 %v1407_v19 }
 0x47d   : > { %v1289_v36 = vpop.f32.mrf.mxu0 }
 0x47e   : > { %v1302_v33 = vpop.f32.mrf.mxu1  ;;  %v2767_v36 = vld [vmem:[%s2844_s3 + $0x10] sm:$0x3] }
 0x480   : > { %v1321_v20 = vpop.permute.xlu1 %1320 }
 0x481   : > { %v1324_v21 = vsel %vm1073_vm10, %v1319_v7, %v1321_v20  ;;  %v1396_v22 = vpop.permute.xlu0 %1395 }
 0x482   : > { %v1335_v23 = vsel %vm488_vm3, %v1324_v21, 0  ;;  %v1399_v24 = vsel %vm1149_vm11, %v1394_v16, %v1396_v22  ;;  %v2050_v16 = vld [vmem:[%s2844_s3 + $0xe] sm:$0x3] }
 0x483   : > { %v1410_v26 = vsel %vm488_vm3, %v1399_v24, 0  ;;  %1370 = vmatpush.bf16.msra.mxu0 %v1335_v23  ;;  %v1276_v34 = vpop.f32.mrf.mxu3  ;;  %v2049_v24 = vld [vmem:[%s2844_s3 + $0xc] sm:$0x3] }
 0x484   : > { %1445 = vmatpush.bf16.msra.mxu3 %v1410_v26 }
 0x485   : > { %2046 = vmatmul.msk.bf16.vlgmr.msra.gmra.mxu2 %vm510_vm5, %v1378_v25 }
 0x486   : > { %2044 = vmatmul.msk.bf16.vlgmr.msra.gmra.mxu0 %vm510_vm5, %v1247_v14 }
 0x487   : > { %2047 = vmatmul.msk.bf16.vlgmr.msra.gmra.mxu3 %vm510_vm5, %v1378_v25 }
 0x488   : > { %v1390_v28 = vpop.permute.xlu1 %1389 }
 0x489   : > { %v1397_v29 = vsel %vm1149_vm11, %v1390_v28, %v1392_v17 }
 0x48a   : > { %v1404_v30 = vsel %vm488_vm3, %v1397_v29, 0 }
 0x48b   : > { %1419 = vmatpush.bf16.msra.mxu1 %v1404_v30 }
 0x48e   : > { %2045 = vmatmul.msk.bf16.vlgmr.msra.gmra.mxu1 %vm510_vm5, %v1378_v25 }
 0x4f8   : > { %v1346_v37 = vpop.f32.mrf.mxu2  ;;  %v1359_v1 = vpop.f32.mrf.mxu3 }
 0x4f9   : > { %v1360_v41 = vadd.f32 %v1359_v1, %v1287_v35 }
 0x500   : > { %v1348_v38 = vpop.f32.mrf.mxu2  ;;  %v1361_v39 = vpop.f32.mrf.mxu3 }
 0x503   : > { %v1372_v40 = vpop.f32.mrf.mxu0 }
 0x508   : > { %v1434_v42 = vpop.f32.mrf.mxu2 }
 0x509   : > { %v1452_v43 = vadd.f32 %v1434_v42, %v1360_v41 }
 0x50a   : > { %v1447_v45 = vpop.f32.mrf.mxu3 }
 0x50b   : > { %v1462_v46 = vadd.f32 %v1459_v44, %v1452_v43  ;;  %v1374_v47 = vpop.f32.mrf.mxu0  ;;  %v1421_v48 = vpop.f32.mrf.mxu1 }
 0x50d   : > { %v2715_v49 = vadd.f32 %v1462_v46, %v2618_v27 }
 0x50f   : > { %vm1468_vm13 = vcmp.ge.f32.partialorder %v2715_v49, 0.0  ;;  %v1471_v50 = vmul.f32 0.1, %v2715_v49 }
 0x510   : > { %v1436_v51 = vpop.f32.mrf.mxu2 }
 0x511   : > { %v1474_v52 = vsel %vm1468_vm13, %v2715_v49, %v1471_v50 }
 0x512   : > { %v1477_v53 = vsel %vm458_vm1, %v1474_v52, 0.0  ;;  %v1449_v54 = vpop.f32.mrf.mxu3 }
 0x513   : > { %v1479_v55 = vpack.c.bf16 %v1477_v53, %v2351_v12  ;;  %v1423_v56 = vpop.f32.mrf.mxu1 }
 0x515   : > { %v1483_v57 = vrot.slane %v1479_v55, 2 }
 0x517   : > { %v1488_v58 = vsel %vm488_vm3, %v1479_v55, %v1483_v57 }
 0x518   : > { %v1492_v27 = vsel %vm496_vm4, %v1488_v58, %v2527_v15 }
 0x519   : > { %1494 = vst [vmem:[#allocation2 + $0x2] sm:$0x3f] %v1492_v27 }
 0x520   : > { %v1498_v59 = vld [vmem:[#allocation2 + $0x2] sm:$0x3f] }
 0x521   : > { %1502 = vst [vmem:[#allocation1] ss:$4 sm:$0xff] %v1498_v59  ;;  %v1495_v62 = vld [vmem:[#allocation2] sm:$0xff] }
 0x522   : > { %v1627_v4 = vld [vmem:[#allocation2 + $0x2] sm:$0xff] }
 0x528   : > { %v1503_v60 = vld.sshfl [vmem:[#allocation1] sm:$0xff pattern:$0x73625140]  ;;  %v1504_v61 = vld.sshfl [vmem:[#allocation1 + $0x8] sm:$0xff pattern:$0x73625140] }
 0x529   : > { %v1505_v63 = vld.sshfl [vmem:[#allocation1 + $0x10] sm:$0xff pattern:$0x73625140]  ;;  %v1509_v0 = vsel %vm488_vm3, %v1503_v60, 0  ;;  %v1511_v2 = vsel %vm488_vm3, %v1504_v61, 0 }
 0x52a   : > { %1555 = vst [vmem:[#allocation1] ss:$4 sm:$0xff] %v1495_v62  ;;  %1522 = vmatpush.bf16.msrb.mxu0 %v1509_v0  ;;  %1535 = vmatpush.bf16.msrb.mxu1 %v1511_v2  ;;  %v1513_v3 = vsel %vm488_vm3, %v1505_v63, 0 }
 0x52b   : > { %1548 = vmatpush.bf16.msrb.mxu2 %v1513_v3 }
 0x52d   : > { %2051 = vmatmul.msk.bf16.vlgmr.msrb.gmra.mxu0 %vm510_vm5, %v2050_v16  ;;  %2052 = vmatmul.msk.bf16.vlgmr.msrb.gmra.mxu1 %vm510_vm5, %v2050_v16 }
 0x52e   : > { %2053 = vmatmul.msk.bf16.vlgmr.msrb.gmra.mxu2 %vm510_vm5, %v2050_v16  ;;  %v1746_v16 = vld [vmem:[#allocation8 + $0xc] sm:$0x3] }
 0x531   : > { %v1556_v5 = vld.sshfl [vmem:[#allocation1] sm:$0xff pattern:$0x73625140]  ;;  %v1558_v7 = vld.sshfl [vmem:[#allocation1 + $0x8] sm:$0xff pattern:$0x73625140] }
 0x532   : > { %v1560_v8 = vld.sshfl [vmem:[#allocation1 + $0x10] sm:$0xff pattern:$0x73625140]  ;;  %v1562_v9 = vld.sshfl [vmem:[#allocation1 + $0x18] sm:$0xff pattern:$0x73625140]  ;;  %1566 = vrot.lane.b32.xlu0 %v1558_v7, %s2357_s0  ;;  %1564 = vrot.lane.b32.xlu2 %v1556_v5, %s2357_s0 }
 0x533   : > { %1631 = vst [vmem:[#allocation1] ss:$4 sm:$0xff] %v1627_v4  ;;  %1568 = vrot.lane.b32.xlu1 %v1560_v8, %s2357_s0  ;;  %v1749_v8 = vld [vmem:[#allocation8 + $0xe] sm:$0x3] }
 0x53a   : > { %v1636_v10 = vld.sshfl [vmem:[#allocation1 + $0x10] sm:$0xff pattern:$0x73625140]  ;;  %v1634_v11 = vld.sshfl [vmem:[#allocation1 + $0x8] sm:$0xff pattern:$0x73625140] }
 0x53b   : > { %1570 = vrot.lane.b32.xlu1 %v1562_v9, %s2357_s0  ;;  %1644 = vrot.lane.b32.xlu0 %v1636_v10, %s2358_s8  ;;  %v1632_v14 = vld.sshfl [vmem:[#allocation1] sm:$0xff pattern:$0x73625140]  ;;  %v1638_v63 = vld.sshfl [vmem:[#allocation1 + $0x18] sm:$0xff pattern:$0x73625140] }
 0x53c   : > { %1642 = vrot.lane.b32.xlu2 %v1634_v11, %s2358_s8  ;;  %v2065_v9 = vld [vmem:[%s2847_s6 + $0x8] sm:$0xf] }
 0x543   : > { %1640 = vrot.lane.b32.xlu0 %v1632_v14, %s2358_s8 }
 0x544   : > { %1710 = vperm.xlu2 %2161, %v2061_v13  }
 0x58c   : > { %v1565_v17 = vpop.permute.xlu2 %1564 }
 0x596   : > { %v1643_v25 = vpop.permute.xlu2 %1642 }
 0x59e   : > { %v1711_v53 = vpop.permute.xlu2 %1710 }
 0x5a4   : > { %v1567_v18 = vpop.permute.xlu0 %1566 }
 0x5a5   : > { %v1569_v19 = vpop.permute.xlu1 %1568  ;;  %v1573_v20 = vsel %vm1572_vm14, %v1565_v17, %v1567_v18 }
 0x5a6   : > { %v1574_v21 = vsel %vm1572_vm14, %v1567_v18, %v1569_v19  ;;  %v1580_v22 = vsel %vm488_vm3, %v1573_v20, 0 }
 0x5a7   : > { %v1583_v23 = vsel %vm488_vm3, %v1574_v21, 0  ;;  %1595 = vmatpush.bf16.msrb.mxu3 %v1580_v22 }
 0x5a8   : > { %1608 = vmatpush.bf16.msra.mxu0 %v1583_v23 }
 0x5aa   : > { %2054 = vmatmul.msk.bf16.vlgmr.msrb.gmra.mxu3 %vm510_vm5, %v2049_v24  ;;  %v1524_v37 = vpop.f32.mrf.mxu0  ;;  %v1537_v39 = vpop.f32.mrf.mxu1 }
 0x5ab   : > { %2055 = vmatmul.msk.bf16.vlgmr.msra.gmra.mxu0 %vm510_vm5, %v2049_v24 }
 0x5ad   : > { %v1571_v26 = vpop.permute.xlu1 %1570  ;;  %v2754_v28 = vpop.permute.xlu0 %1644 }
 0x5ae   : > { %v1575_v29 = vsel %vm1572_vm14, %v1569_v19, %v1571_v26  ;;  %v1650_v30 = vsel %vm1648_vm15, %v1643_v25, %v2754_v28 }
 0x5af   : > { %v1586_v31 = vsel %vm488_vm3, %v1575_v29, 0  ;;  %v1659_v32 = vsel %vm488_vm3, %v1650_v30, 0 }
 0x5b0   : > { %1621 = vmatpush.bf16.msra.mxu1 %v1586_v31  ;;  %1684 = vmatpush.bf16.msra.mxu3 %v1659_v32 }
 0x5b1   : > { %v1550_v1 = vpop.f32.mrf.mxu2 }
 0x5b2   : > { %v1526_v38 = vpop.f32.mrf.mxu0  ;;  %v1539_v41 = vpop.f32.mrf.mxu1 }
 0x5b3   : > { %2056 = vmatmul.msk.bf16.vlgmr.msra.gmra.mxu1 %vm510_vm5, %v2049_v24  ;;  %v1803_v24 = vld [vmem:[#allocation8 + $0x10] sm:$0x3] }
 0x5b5   : > { %v1641_v33 = vpop.permute.xlu0 %1640 }
 0x5b6   : > { %v1649_v34 = vsel %vm1648_vm15, %v1641_v33, %v1643_v25 }
 0x5b7   : > { %v1656_v35 = vsel %vm488_vm3, %v1649_v34, 0 }
 0x5b8   : > { %1671 = vmatpush.bf16.msra.mxu2 %v1656_v35 }
 0x5b9   : > { %v1552_v40 = vpop.f32.mrf.mxu2 }
 0x5ba   : > { %2059 = vmatmul.msk.bf16.vlgmr.msra.gmra.mxu3 %vm510_vm5, %v2767_v36 }
 0x5bb   : > { %2058 = vmatmul.msk.bf16.vlgmr.msra.gmra.mxu2 %vm510_vm5, %v2767_v36 }
 0x628   : > { %v1610_v42 = vpop.f32.mrf.mxu0 }
 0x629   : > { %v1611_v48 = vadd.f32 %v1610_v42, %v1537_v39 }
 0x62d   : > { %v1597_v43 = vpop.f32.mrf.mxu3 }
 0x630   : > { %v1612_v44 = vpop.f32.mrf.mxu0  ;;  %v1623_v45 = vpop.f32.mrf.mxu1 }
 0x635   : > { %v1599_v46 = vpop.f32.mrf.mxu3 }
 0x638   : > { %v1625_v47 = vpop.f32.mrf.mxu1 }
 0x63d   : > { %v1686_v50 = vpop.f32.mrf.mxu3 }
 0x63e   : > { %v1704_v51 = vadd.f32 %v1686_v50, %v1611_v48  ;;  %v1673_v52 = vpop.f32.mrf.mxu2 }
 0x640   : > { %v1714_v54 = vadd.f32 %v1711_v53, %v1704_v51 }
 0x642   : > { %vm1717_vm0 = vcmp.ge.f32.partialorder %v1714_v54, 0.0  ;;  %v1720_v55 = vmul.f32 0.1, %v1714_v54 }
 0x644   : > { %v1723_v56 = vsel %vm1717_vm0, %v1714_v54, %v1720_v55 }
 0x645   : > { %v1726_v57 = vsel %vm458_vm1, %v1723_v56, 0.0  ;;  %v1688_v58 = vpop.f32.mrf.mxu3 }
 0x646   : > { %v1728_v27 = vpack.c.bf16 %v1726_v57, %v2351_v12  ;;  %v1675_v59 = vpop.f32.mrf.mxu2 }
 0x648   : > { %v1732_v60 = vrot.slane %v1728_v27, 2 }
 0x64a   : > { %v1737_v61 = vsel %vm488_vm3, %v1728_v27, %v1732_v60 }
 0x64b   : > { %v1741_v62 = vsel %vm496_vm4, %v1737_v61, %v2527_v15 }
 0x64c   : > { %1743 = vst [vmem:[#allocation2 + $0x2] sm:$0x3f] %v1741_v62 }
 0x653   : > { %v1747_v0 = vld [vmem:[#allocation2 + $0x2] sm:$0x3f] }
 0x654   : > { %1751 = vst [vmem:[#allocation1] ss:$4 sm:$0xff] %v1747_v0  ;;  %v1744_v2 = vld [vmem:[#allocation2] sm:$0xff] }
 0x655   : > { %v1801_v6 = vld [vmem:[#allocation2 + $0x2] sm:$0xff] }
 0x65b   : > { %v1752_v3 = vld.sshfl [vmem:[#allocation1 + $0x8] sm:$0xff pattern:$0x73625140] }
 0x65c   : > { %v1756_v4 = vsel %vm488_vm3, %v1752_v3, 0  ;;  %1772 = vst [vmem:[#allocation1] ss:$4 sm:$0xff] %v1744_v2 }
 0x65d   : > { %1765 = vmatpush.bf16.msrb.mxu1 %v1756_v4 }
 0x660   : > { %2062 = vmatmul.msk.bf16.vlgmr.msrb.gmra.mxu1 %vm510_vm5, %v1749_v8 }
 0x663   : > { %v1775_v5 = vld.sshfl [vmem:[#allocation1 + $0x10] sm:$0xff pattern:$0x73625140]  ;;  %v1773_v12 = vld.sshfl [vmem:[#allocation1 + $0x8] sm:$0xff pattern:$0x73625140] }
 0x664   : > { %1779 = vrot.lane.b32.xlu0 %v1775_v5, %s2357_s0  ;;  %1777 = vrot.lane.b32.xlu2 %v1773_v12, %s2357_s0  ;;  %1805 = vst [vmem:[#allocation1] ss:$4 sm:$0xff] %v1801_v6  ;;  %s2270_s0 = scalar_lea.hbm %s2269_s22, 4 }
 0x665   : > { %p2271_p1 = scmp.ne.s32.totalorder %s2269_s22, %s2270_s0  ;;  %p2276_p12 = scmp.lt.s32.totalorder %s2274_s13, %s2270_s0 }
 0x667   : > { %p2272_p9 = pnand %p2271_p1, %p2470_p4  ;;  %p2277_p13 = por %p2276_p12, %p2275_p11 }
 0x669   : > { %p2273_p10 = pneg %p2272_p9 }
 0x66b   : > { %v1808_v7 = vld.sshfl [vmem:[#allocation1 + $0x10] sm:$0xff pattern:$0x73625140]  ;;  %v1806_v15 = vld.sshfl [vmem:[#allocation1 + $0x8] sm:$0xff pattern:$0x73625140]  ;;  %p2278_p0 = pnand %p2277_p13, %p2273_p10 }
 0x66c   : > { %1646 = vrot.lane.b32.xlu0 %v1638_v63, %s2358_s8  ;;  %1812 = vrot.lane.b32.xlu2 %v1808_v7, %s2358_s8 }
 0x66d   : > { %1810 = vrot.lane.b32.xlu1 %v1806_v15, %s2358_s8 }
 0x675   : > { %1839 = vperm.xlu1 %2162, %v2065_v9  }
 0x6be   : > { %v1778_v10 = vpop.permute.xlu2 %1777 }
 0x6c6   : > { %v1813_v18 = vpop.permute.xlu2 %1812 }
 0x6d6   : > { %v1780_v11 = vpop.permute.xlu0 %1779 }
 0x6d7   : > { %v1781_v13 = vsel %vm1572_vm14, %v1778_v10, %v1780_v11 }
 0x6d8   : > { %v1786_v14 = vsel %vm488_vm3, %v1781_v13, 0 }
 0x6d9   : > { %1795 = vmatpush.bf16.msrb.mxu2 %v1786_v14 }
 0x6dc   : > { %2063 = vmatmul.msk.bf16.vlgmr.msrb.gmra.mxu2 %vm510_vm5, %v1746_v16 }
 0x6dd   : > { %v1767_v25 = vpop.f32.mrf.mxu1 }
 0x6de   : > { %v1647_v17 = vpop.permute.xlu0 %1646 }
 0x6df   : > { %v1651_v19 = vsel %vm1648_vm15, %v2754_v28, %v1647_v17  ;;  %v1811_v20 = vpop.permute.xlu1 %1810 }
 0x6e0   : > { %v1662_v21 = vsel %vm488_vm3, %v1651_v19, 0  ;;  %v1814_v22 = vsel %vm1648_vm15, %v1811_v20, %v1813_v18 }
 0x6e1   : > { %v1819_v23 = vsel %vm488_vm3, %v1814_v22, 0  ;;  %1697 = vmatpush.bf16.msrb.mxu0 %v1662_v21 }
 0x6e2   : > { %1828 = vmatpush.bf16.msrb.mxu3 %v1819_v23 }
 0x6e4   : > { %2060 = vmatmul.msk.bf16.vlgmr.msrb.gmra.mxu0 %vm510_vm5, %v2767_v36 }
 0x6e5   : > { %2064 = vmatmul.msk.bf16.vlgmr.msrb.gmra.mxu3 %vm510_vm5, %v1803_v24  ;;  %v1769_v26 = vpop.f32.mrf.mxu1 }
 0x6e7   : > { %v1840_v33 = vpop.permute.xlu1 %1839 }
 0x75f   : > { %v1797_v29 = vpop.f32.mrf.mxu2 }
 0x760   : > { %v1798_v30 = vadd.f32 %v1797_v29, %v1767_v25 }
 0x761   : > { %v1699_v28 = vpop.f32.mrf.mxu0 }
 0x767   : > { %v1799_v31 = vpop.f32.mrf.mxu2 }
 0x768   : > { %v1830_v32 = vpop.f32.mrf.mxu3 }
 0x769   : > { %v1834_v34 = vadd.f32 %v1830_v32, %v1798_v30  ;;  %v1701_v35 = vpop.f32.mrf.mxu0 }
 0x76b   : > { %v1842_v36 = vadd.f32 %v1840_v33, %v1834_v34 }
 0x76d   : > { %v1843_v37 = vadd.f32 %v1842_v36, %v2715_v49 }
 0x76f   : > { %1844 = vst [vmem:[%s2514_s27] sm:$0xf] %v1843_v37 }
 0x770   : > { %v1832_v1 = vpop.f32.mrf.mxu3 }
 0x771   : > { %2281 = shalt.err (!%p2278_p0)
}
 0x772   : > { %2079 = dma.vmem_to_hbm [thread:$0]  (%p2470_p4), %s1860_s16, 64, %s1862_s19, %s1846_s26  }
 0x773 PF: > { %s2867_s18 = sld [smem:[#allocation14_spill]]  ;;  %p2093_p2 = pnand %p1994_p6, %p2478_p7 }
 0x775   : > { %p2094_p5 = pneg %p2093_p2 }
 0x779   : > { %s1873_s20 = sand.u32 1, %s2867_s18  }
 0x77a   : > { %s1874_s17 = scalar_lea.sflag [#allocation5], %s1873_s20 }
 0x77b   : > { %2319 = dma.done.wait (%p2094_p5), %s1874_s17, 64  }
 0x77c   : > { %2321 = vsyncadd (%p2094_p5), %s1874_s17, 4294967232  ;;  %s26_s28 = sadd.s32 1, %s2344_s28   ;;  %s2869_s11 = sld [smem:[#allocation15_spill]] }
 0x77d   : > { %p23_p8 = scmp.ge.s32.totalorder %s26_s28, 4   ;;  %s2870_s25 = sld [smem:[#allocation18_spill]] }
 0x77e   : > { %s2871_s26 = sld [smem:[#allocation16_spill]]  ;;  %s2873_s23 = smov %s2328_s24 }
 0x77f   : > { %s2872_s27 = sld [smem:[#allocation17_spill]]  ;;  %25 = sbr.rel (!%p23_p8) target bundleno = 10 (0xa), region = 137 }
 0x782   : > { %s2874_s24 = smov %s2869_s11 }
 0x784   :  { %1880 = vsyncpa [#allocation4], 1 }
 0x785   :  { %1882 = vsyncpa [#allocation4 + $0x1], 1 }
 0x786   :  { %1883 = vsyncpa [#allocation7], 1 }
 0x787   :  { %1885 = vsyncpa [#allocation7 + $0x1], 1 }
 0x788   :  { %1886 = vsyncpa [#allocation5], 1 }
 0x789   :  { %1888 = vsyncpa [#allocation5 + $0x1], 1 }

</bundles_post_ra>
